<compile_context>
chip_gen: v7x
topology: tpu7x:2x2x1
jax: 0.10.0
libtpu: 0.0.40
codegen_flags: <defaults>
</compile_context>

<pallas_src>
import jax
import jax.numpy as jnp
import numpy as np
from jax.experimental import pallas as pl
from jax.experimental.pallas import tpu as pltpu


# ----------------------------------------------------------------------------
# Pallas kernel
# ----------------------------------------------------------------------------
def _make_prnet_kernel(num_layers, L, B, H, input_dim):
    G = 4 * H

    def kernel(x_ref, wih0_ref, wih_ref, whh_ref, b_ref, fcw_ref, fcb_ref,
               out_ref, pre_ref):
        # Hoisted lane-mask constants for the whole-vreg gate nonlinearity:
        # sigmoid(x) = 0.5 + 0.5*tanh(x/2), so with scale=0.5 / offset=0.5 on
        # the i/f/o lanes and scale=1 / offset=0 on the g lanes, ONE full
        # (B,4H) tanh replaces 3 sigmoids + 1 tanh per step on the single-slot EUP.
        lane = jax.lax.broadcasted_iota(jnp.int32, (B, G), 1)
        is_g = jnp.logical_and(lane >= 2 * H, lane < 3 * H)
        scale = jnp.where(is_g, jnp.float32(1.0), jnp.float32(0.5))
        offset = jnp.where(is_g, jnp.float32(0.0), jnp.float32(0.5))

        # Layer-0 input projection.  input_dim == 1 => outer product on the VPU
        # (no MXU pass over 97% zero K); general case: one f32 matmul.
        if input_dim == 1:
            pre0 = x_ref[...] * wih0_ref[...] + b_ref[0]
        else:
            pre0 = (jnp.dot(x_ref[...], wih0_ref[...],
                            preferred_element_type=jnp.float32) + b_ref[0])
        pre_ref[...] = pre0                              # (L*B, 4H) f32

        h = jnp.zeros((B, H), jnp.float32)
        for l in range(num_layers):                      # static unroll over layers
            w_hh = whh_ref[l]                            # (H, 4H) bf16, loaded once
            last_layer = (l == num_layers - 1)
            if not last_layer:
                w_ih_next = wih_ref[l]                   # layer l+1 W_ih^T (H,4H) bf16
                b_next = b_ref[l + 1]                    # (1, 4H) f32
            h = jnp.zeros((B, H), jnp.float32)
            c = jnp.zeros((B, H), jnp.float32)

            for t in range(L):                           # static unroll (L is tiny)
                # Only the recurrent matmul remains on the serial chain.
                # TODO(synk): resident-RHS MXU driving (pltpu.matmul_push_rhs /
                # matmul_acc_lhs / matmul_pop) could keep W_hh latched across the
                # L steps; kept as jnp.dot for portability/correctness here.
                gates = pre_ref[t * B:(t + 1) * B, :] + jnp.dot(
                    h.astype(jnp.bfloat16), w_hh,
                    preferred_element_type=jnp.float32)  # (B, 4H) f32
                y = jnp.tanh(gates * scale)              # one full-vreg EUP pass
                act = offset + scale * y                 # i/f/o -> sigmoid, g -> tanh
                i_g = act[:, 0:H]
                f_g = act[:, H:2 * H]
                g_g = act[:, 2 * H:3 * H]
                o_g = act[:, 3 * H:4 * H]
                c = f_g * c + i_g * g_g
                h = o_g * jnp.tanh(c)
                if not last_layer:
                    # Fused next-layer input projection: depends only on h_t and
                    # is off layer-l's critical path; overwrites the slot this
                    # step already consumed.
                    pre_ref[t * B:(t + 1) * B, :] = (
                        jnp.dot(h.astype(jnp.bfloat16), w_ih_next,
                                preferred_element_type=jnp.float32) + b_next)
            # nn.LSTM inter-layer dropout(p=0.1) is training-only; the eval
            # forward pass implemented here does not apply it.

        # fc1 on the last timestep of the top layer: VPU multiply + lane reduce
        # (cheaper than a 1-column MXU matmul).
        out_ref[...] = (jnp.sum(h * fcw_ref[...], axis=-1, keepdims=True)
                        + fcb_ref[...])

    return kernel


# ----------------------------------------------------------------------------
# Wrapper (parameter packing / reshapes = glue; compute lives in the kernel)
# ----------------------------------------------------------------------------
def prnet_forward(x, params, *, input_dim, predict_len, hidden_size, num_layers):
    L, H = predict_len, hidden_size
    # replicate: x.permute(1, 0).view(max_length, -1, input_dim)
    x_seq = jnp.transpose(x).reshape(L, -1, input_dim).astype(jnp.float32)
    B = x_seq.shape[1]
    x_flat = x_seq.reshape(L * B, input_dim)             # (L*B, input_dim) f32

    wih0 = params["weight_ih_l0"].T.astype(jnp.float32)  # (input_dim, 4H) f32 (VPU)
    whh_list, b_list, wih_rest = [], [], []
    for l in range(num_layers):
        whh_list.append(params[f"weight_hh_l{l}"].T)                      # (H, 4H)
        b_list.append((params[f"bias_ih_l{l}"]
                       + params[f"bias_hh_l{l}"]).reshape(1, 4 * H))      # (1, 4H)
        if l >= 1:
            wih_rest.append(params[f"weight_ih_l{l}"].T)                  # (H, 4H)
    # MXU operands in bf16 (native on v5e/v6e/v7x); biases / state stay f32.
    whh = jnp.stack(whh_list).astype(jnp.bfloat16)        # (NL, H, 4H)
    bias = jnp.stack(b_list).astype(jnp.float32)          # (NL, 1, 4H)
    if wih_rest:
        wih = jnp.stack(wih_rest).astype(jnp.bfloat16)    # (NL-1, H, 4H)
    else:
        wih = jnp.zeros((1, H, 4 * H), jnp.bfloat16)      # dummy (never read)
    fcw = params["fc1_weight"].astype(jnp.float32)        # (1, H)
    fcb = params["fc1_bias"].reshape(1, 1).astype(jnp.float32)

    kernel = _make_prnet_kernel(num_layers, L, B, H, input_dim)
    out = pl.pallas_call(
        kernel,
        out_shape=jax.ShapeDtypeStruct((B, 1), jnp.float32),
        in_specs=[pl.BlockSpec(memory_space=pltpu.MemorySpace.VMEM)] * 7,
        out_specs=pl.BlockSpec(memory_space=pltpu.MemorySpace.VMEM),
        scratch_shapes=[
            pltpu.VMEM((L * B, 4 * H), jnp.float32),      # staged pre-activations
        ],
    )(x_flat, wih0, wih, whh, bias, fcw, fcb)
    return out.reshape(-1)                                # res.view(-1)


# ----------------------------------------------------------------------------
# Deterministic parameter init (PyTorch-style U(-1/sqrt(H), 1/sqrt(H)))
# ----------------------------------------------------------------------------
def init_params(key, *, input_dim, hidden_size, num_layers):
    H = hidden_size
    k = 1.0 / np.sqrt(H)
    params = {}
    for l in range(num_layers):
        in_l = input_dim if l == 0 else H
        key, k1, k2, k3, k4 = jax.random.split(key, 5)
        params[f"weight_ih_l{l}"] = jax.random.uniform(k1, (4 * H, in_l), jnp.float32, -k, k)
        params[f"weight_hh_l{l}"] = jax.random.uniform(k2, (4 * H, H), jnp.float32, -k, k)
        params[f"bias_ih_l{l}"] = jax.random.uniform(k3, (4 * H,), jnp.float32, -k, k)
        params[f"bias_hh_l{l}"] = jax.random.uniform(k4, (4 * H,), jnp.float32, -k, k)
    key, k1, k2 = jax.random.split(key, 3)
    params["fc1_weight"] = jax.random.uniform(k1, (1, H), jnp.float32, -k, k)
    params["fc1_bias"] = jax.random.uniform(k2, (1,), jnp.float32, -k, k)
    return params


# ----------------------------------------------------------------------------
# Pure-numpy reference (float64, full-precision weights) for a sanity check
# ----------------------------------------------------------------------------
def prnet_reference(x, params, *, input_dim, predict_len, hidden_size, num_layers):
    L, H = predict_len, hidden_size
    x = np.asarray(x, np.float64)
    inp = x.T.reshape(L, -1, input_dim)
    B = inp.shape[1]
    for l in range(num_layers):
        w_ih = np.asarray(params[f"weight_ih_l{l}"], np.float64)
        w_hh = np.asarray(params[f"weight_hh_l{l}"], np.float64)
        b = np.asarray(params[f"bias_ih_l{l}"], np.float64) + \
            np.asarray(params[f"bias_hh_l{l}"], np.float64)
        h = np.zeros((B, H)); c = np.zeros((B, H))
        outs = []
        for t in range(L):
            gates = inp[t] @ w_ih.T + h @ w_hh.T + b
            sig = lambda z: 1.0 / (1.0 + np.exp(-z))
            i_g, f_g = sig(gates[:, :H]), sig(gates[:, H:2 * H])
            g_g, o_g = np.tanh(gates[:, 2 * H:3 * H]), sig(gates[:, 3 * H:4 * H])
            c = f_g * c + i_g * g_g
            h = o_g * np.tanh(c)
            outs.append(h)
        inp = np.stack(outs)
    w_fc = np.asarray(params["fc1_weight"], np.float64)
    b_fc = np.asarray(params["fc1_bias"], np.float64)
    return (inp[-1] @ w_fc.T + b_fc).reshape(-1)


if __name__ == "__main__":
    args = dict(input_dim=1, batch_size=8, predict_len=8, hidden_size=32, num_layers=2)

    key = jax.random.PRNGKey(0)
    key, pkey, xkey = jax.random.split(key, 3)
    params = init_params(pkey, input_dim=args["input_dim"],
                         hidden_size=args["hidden_size"],
                         num_layers=args["num_layers"])
    # x: (batch_size, predict_len * input_dim) -- as fed to PRNet.forward
    x = jax.random.normal(xkey, (args["batch_size"],
                                 args["predict_len"] * args["input_dim"]),
                          dtype=jnp.float32)

    out = prnet_forward(x, params,
                        input_dim=args["input_dim"],
                        predict_len=args["predict_len"],
                        hidden_size=args["hidden_size"],
                        num_layers=args["num_layers"])
    out = jax.block_until_ready(out)

    ref = prnet_reference(x, params,
                          input_dim=args["input_dim"],
                          predict_len=args["predict_len"],
                          hidden_size=args["hidden_size"],
                          num_layers=args["num_layers"])
    # LSTM matmul operands are bf16 on the MXU (f32 accumulate), and the h->bf16
    # cast compounds over 8 steps x 2 layers vs the float64 reference.
    np.testing.assert_allclose(np.asarray(out), ref, rtol=5e-2, atol=5e-2)
    print("KERNEL_OK")
</pallas_src>

<mosaic_0001>
module attributes {stable_mosaic.version = 11 : i64} {
  func.func @kernel(%arg0: memref<64x1xf32, #tpu.memory_space<vmem>>, %arg1: memref<1x128xf32, #tpu.memory_space<vmem>>, %arg2: memref<1x32x128xbf16, #tpu.memory_space<vmem>>, %arg3: memref<2x32x128xbf16, #tpu.memory_space<vmem>>, %arg4: memref<2x1x128xf32, #tpu.memory_space<vmem>>, %arg5: memref<1x32xf32, #tpu.memory_space<vmem>>, %arg6: memref<1x1xf32, #tpu.memory_space<vmem>>, %arg7: memref<8x1xf32, #tpu.memory_space<vmem>>, %arg8: memref<64x128xf32, #tpu.memory_space<vmem>>) attributes {dimension_semantics = [], scalar_prefetch = 0 : i64, scratch_operands = 1 : i64, tpu.core_type = #tpu.core_type<tc>} {
    %0 = tpu.iota {dimensions = array<i32: 1>} : vector<8x128xi32>
    %c64_i32 = arith.constant 64 : i32
    %1 = vector.broadcast %c64_i32 : i32 to vector<8x128xi32>
    %2 = arith.cmpi sge, %0, %1 : vector<8x128xi32>
    %c96_i32 = arith.constant 96 : i32
    %3 = vector.broadcast %c96_i32 : i32 to vector<8x128xi32>
    %4 = arith.cmpi slt, %0, %3 : vector<8x128xi32>
    %5 = arith.andi %2, %4 : vector<8x128xi1>
    %cst = arith.constant 1.000000e+00 : f32
    %cst_0 = arith.constant 5.000000e-01 : f32
    %6 = vector.broadcast %cst : f32 to vector<8x128xf32>
    %7 = vector.broadcast %cst_0 : f32 to vector<8x128xf32>
    %8 = arith.select %5, %6, %7 : vector<8x128xi1>, vector<8x128xf32>
    %cst_1 = arith.constant 0.000000e+00 : f32
    %cst_2 = arith.constant 5.000000e-01 : f32
    %9 = vector.broadcast %cst_1 : f32 to vector<8x128xf32>
    %10 = vector.broadcast %cst_2 : f32 to vector<8x128xf32>
    %11 = arith.select %5, %9, %10 : vector<8x128xi1>, vector<8x128xf32>
    %c0 = arith.constant 0 : index
    %c0_3 = arith.constant 0 : index
    %12 = vector.load %arg0[%c0, %c0_3] : memref<64x1xf32, #tpu.memory_space<vmem>>, vector<64x1xf32>
    %c0_4 = arith.constant 0 : index
    %c0_5 = arith.constant 0 : index
    %13 = vector.load %arg1[%c0_4, %c0_5] : memref<1x128xf32, #tpu.memory_space<vmem>>, vector<1x128xf32>
    %14 = vector.broadcast %12 : vector<64x1xf32> to vector<64x128xf32>
    %15 = vector.broadcast %13 : vector<1x128xf32> to vector<64x128xf32>
    %16 = arith.mulf %14, %15 : vector<64x128xf32>
    %c0_6 = arith.constant 0 : index
    %c0_7 = arith.constant 0 : index
    %c0_8 = arith.constant 0 : index
    %17 = vector.load %arg4[%c0_6, %c0_7, %c0_8] : memref<2x1x128xf32, #tpu.memory_space<vmem>>, vector<1x1x128xf32>
    %18 = vector.shape_cast %17 : vector<1x1x128xf32> to vector<1x128xf32>
    %19 = vector.broadcast %18 : vector<1x128xf32> to vector<64x128xf32>
    %20 = arith.addf %16, %19 : vector<64x128xf32>
    %c0_9 = arith.constant 0 : index
    %c0_10 = arith.constant 0 : index
    %21 = vector.load %arg8[%c0_9, %c0_10] : memref<64x128xf32, #tpu.memory_space<vmem>>, vector<64x128xf32>
    tpu.vector_store %arg8[%c0_9, %c0_10], %20 {strides = array<i32>} : memref<64x128xf32, #tpu.memory_space<vmem>>, vector<64x128xf32>,
    %c0_11 = arith.constant 0 : index
    %c0_12 = arith.constant 0 : index
    %c0_13 = arith.constant 0 : index
    %22 = vector.load %arg3[%c0_11, %c0_12, %c0_13] : memref<2x32x128xbf16, #tpu.memory_space<vmem>>, vector<1x32x128xbf16>
    %23 = vector.shape_cast %22 : vector<1x32x128xbf16> to vector<32x128xbf16>
    %c0_14 = arith.constant 0 : index
    %c0_15 = arith.constant 0 : index
    %c0_16 = arith.constant 0 : index
    %24 = vector.load %arg2[%c0_14, %c0_15, %c0_16] : memref<1x32x128xbf16, #tpu.memory_space<vmem>>, vector<1x32x128xbf16>
    %25 = vector.shape_cast %24 : vector<1x32x128xbf16> to vector<32x128xbf16>
    %c1 = arith.constant 1 : index
    %c0_17 = arith.constant 0 : index
    %c0_18 = arith.constant 0 : index
    %26 = vector.load %arg4[%c1, %c0_17, %c0_18] : memref<2x1x128xf32, #tpu.memory_space<vmem>>, vector<1x1x128xf32>
    %27 = vector.shape_cast %26 : vector<1x1x128xf32> to vector<1x128xf32>
    %cst_19 = arith.constant 0.000000e+00 : f32
    %28 = vector.broadcast %cst_19 : f32 to vector<8x32xf32>
    %cst_20 = arith.constant 0.000000e+00 : f32
    %29 = vector.broadcast %cst_20 : f32 to vector<8x32xf32>
    %c0_21 = arith.constant 0 : index
    %c0_22 = arith.constant 0 : index
    %30 = vector.load %arg8[%c0_21, %c0_22] : memref<64x128xf32, #tpu.memory_space<vmem>>, vector<8x128xf32>
    %31 = arith.truncf %28 : vector<8x32xf32> to vector<8x32xbf16>
    %cst_23 = arith.constant dense<0.000000e+00> : vector<8x128xf32>
    %32 = tpu.matmul %31, %23, %cst_23 {dimension_numbers = #tpu.dot_dimension_numbers<[1], [0], [0], [1], [0, 0, 1, 1], [], []>} : vector<8x32xbf16>, vector<32x128xbf16>, vector<8x128xf32> -> vector<8x128xf32>
    %33 = arith.addf %30, %32 : vector<8x128xf32>
    %34 = arith.mulf %33, %8 : vector<8x128xf32>
    %35 = math.tanh %34 : vector<8x128xf32>
    %36 = arith.mulf %8, %35 : vector<8x128xf32>
    %37 = arith.addf %11, %36 : vector<8x128xf32>
    %38 = vector.extract_strided_slice %37 {offsets = [0, 0], sizes = [8, 32], strides = [1, 1]} : vector<8x128xf32> to vector<8x32xf32>
    %39 = vector.extract_strided_slice %37 {offsets = [0, 32], sizes = [8, 32], strides = [1, 1]} : vector<8x128xf32> to vector<8x32xf32>
    %40 = vector.extract_strided_slice %37 {offsets = [0, 64], sizes = [8, 32], strides = [1, 1]} : vector<8x128xf32> to vector<8x32xf32>
    %41 = vector.extract_strided_slice %37 {offsets = [0, 96], sizes = [8, 32], strides = [1, 1]} : vector<8x128xf32> to vector<8x32xf32>
    %42 = arith.mulf %39, %29 : vector<8x32xf32>
    %43 = arith.mulf %38, %40 : vector<8x32xf32>
    %44 = arith.addf %42, %43 : vector<8x32xf32>
    %45 = math.tanh %44 : vector<8x32xf32>
    %46 = arith.mulf %41, %45 : vector<8x32xf32>
    %47 = arith.truncf %46 : vector<8x32xf32> to vector<8x32xbf16>
    %cst_24 = arith.constant dense<0.000000e+00> : vector<8x128xf32>
    %48 = tpu.matmul %47, %25, %cst_24 {dimension_numbers = #tpu.dot_dimension_numbers<[1], [0], [0], [1], [0, 0, 1, 1], [], []>} : vector<8x32xbf16>, vector<32x128xbf16>, vector<8x128xf32> -> vector<8x128xf32>
    %49 = vector.broadcast %27 : vector<1x128xf32> to vector<8x128xf32>
    %50 = arith.addf %48, %49 : vector<8x128xf32>
    %c0_25 = arith.constant 0 : index
    %c0_26 = arith.constant 0 : index
    %51 = vector.load %arg8[%c0_25, %c0_26] : memref<64x128xf32, #tpu.memory_space<vmem>>, vector<8x128xf32>
    tpu.vector_store %arg8[%c0_25, %c0_26], %50 {strides = array<i32>} : memref<64x128xf32, #tpu.memory_space<vmem>>, vector<8x128xf32>,
    %c8 = arith.constant 8 : index
    %c0_27 = arith.constant 0 : index
    %52 = vector.load %arg8[%c8, %c0_27] : memref<64x128xf32, #tpu.memory_space<vmem>>, vector<8x128xf32>
    %53 = arith.truncf %46 : vector<8x32xf32> to vector<8x32xbf16>
    %cst_28 = arith.constant dense<0.000000e+00> : vector<8x128xf32>
    %54 = tpu.matmul %53, %23, %cst_28 {dimension_numbers = #tpu.dot_dimension_numbers<[1], [0], [0], [1], [0, 0, 1, 1], [], []>} : vector<8x32xbf16>, vector<32x128xbf16>, vector<8x128xf32> -> vector<8x128xf32>
    %55 = arith.addf %52, %54 : vector<8x128xf32>
    %56 = arith.mulf %55, %8 : vector<8x128xf32>
    %57 = math.tanh %56 : vector<8x128xf32>
    %58 = arith.mulf %8, %57 : vector<8x128xf32>
    %59 = arith.addf %11, %58 : vector<8x128xf32>
    %60 = vector.extract_strided_slice %59 {offsets = [0, 0], sizes = [8, 32], strides = [1, 1]} : vector<8x128xf32> to vector<8x32xf32>
    %61 = vector.extract_strided_slice %59 {offsets = [0, 32], sizes = [8, 32], strides = [1, 1]} : vector<8x128xf32> to vector<8x32xf32>
    %62 = vector.extract_strided_slice %59 {offsets = [0, 64], sizes = [8, 32], strides = [1, 1]} : vector<8x128xf32> to vector<8x32xf32>
    %63 = vector.extract_strided_slice %59 {offsets = [0, 96], sizes = [8, 32], strides = [1, 1]} : vector<8x128xf32> to vector<8x32xf32>
    %64 = arith.mulf %61, %44 : vector<8x32xf32>
    %65 = arith.mulf %60, %62 : vector<8x32xf32>
    %66 = arith.addf %64, %65 : vector<8x32xf32>
    %67 = math.tanh %66 : vector<8x32xf32>
    %68 = arith.mulf %63, %67 : vector<8x32xf32>
    %69 = arith.truncf %68 : vector<8x32xf32> to vector<8x32xbf16>
    %cst_29 = arith.constant dense<0.000000e+00> : vector<8x128xf32>
    %70 = tpu.matmul %69, %25, %cst_29 {dimension_numbers = #tpu.dot_dimension_numbers<[1], [0], [0], [1], [0, 0, 1, 1], [], []>} : vector<8x32xbf16>, vector<32x128xbf16>, vector<8x128xf32> -> vector<8x128xf32>
    %71 = vector.broadcast %27 : vector<1x128xf32> to vector<8x128xf32>
    %72 = arith.addf %70, %71 : vector<8x128xf32>
    %c8_30 = arith.constant 8 : index
    %c0_31 = arith.constant 0 : index
    %73 = vector.load %arg8[%c8_30, %c0_31] : memref<64x128xf32, #tpu.memory_space<vmem>>, vector<8x128xf32>
    tpu.vector_store %arg8[%c8_30, %c0_31], %72 {strides = array<i32>} : memref<64x128xf32, #tpu.memory_space<vmem>>, vector<8x128xf32>,
    %c16 = arith.constant 16 : index
    %c0_32 = arith.constant 0 : index
    %74 = vector.load %arg8[%c16, %c0_32] : memref<64x128xf32, #tpu.memory_space<vmem>>, vector<8x128xf32>
    %75 = arith.truncf %68 : vector<8x32xf32> to vector<8x32xbf16>
    %cst_33 = arith.constant dense<0.000000e+00> : vector<8x128xf32>
    %76 = tpu.matmul %75, %23, %cst_33 {dimension_numbers = #tpu.dot_dimension_numbers<[1], [0], [0], [1], [0, 0, 1, 1], [], []>} : vector<8x32xbf16>, vector<32x128xbf16>, vector<8x128xf32> -> vector<8x128xf32>
    %77 = arith.addf %74, %76 : vector<8x128xf32>
    %78 = arith.mulf %77, %8 : vector<8x128xf32>
    %79 = math.tanh %78 : vector<8x128xf32>
    %80 = arith.mulf %8, %79 : vector<8x128xf32>
    %81 = arith.addf %11, %80 : vector<8x128xf32>
    %82 = vector.extract_strided_slice %81 {offsets = [0, 0], sizes = [8, 32], strides = [1, 1]} : vector<8x128xf32> to vector<8x32xf32>
    %83 = vector.extract_strided_slice %81 {offsets = [0, 32], sizes = [8, 32], strides = [1, 1]} : vector<8x128xf32> to vector<8x32xf32>
    %84 = vector.extract_strided_slice %81 {offsets = [0, 64], sizes = [8, 32], strides = [1, 1]} : vector<8x128xf32> to vector<8x32xf32>
    %85 = vector.extract_strided_slice %81 {offsets = [0, 96], sizes = [8, 32], strides = [1, 1]} : vector<8x128xf32> to vector<8x32xf32>
    %86 = arith.mulf %83, %66 : vector<8x32xf32>
    %87 = arith.mulf %82, %84 : vector<8x32xf32>
    %88 = arith.addf %86, %87 : vector<8x32xf32>
    %89 = math.tanh %88 : vector<8x32xf32>
    %90 = arith.mulf %85, %89 : vector<8x32xf32>
    %91 = arith.truncf %90 : vector<8x32xf32> to vector<8x32xbf16>
    %cst_34 = arith.constant dense<0.000000e+00> : vector<8x128xf32>
    %92 = tpu.matmul %91, %25, %cst_34 {dimension_numbers = #tpu.dot_dimension_numbers<[1], [0], [0], [1], [0, 0, 1, 1], [], []>} : vector<8x32xbf16>, vector<32x128xbf16>, vector<8x128xf32> -> vector<8x128xf32>
    %93 = vector.broadcast %27 : vector<1x128xf32> to vector<8x128xf32>
    %94 = arith.addf %92, %93 : vector<8x128xf32>
    %c16_35 = arith.constant 16 : index
    %c0_36 = arith.constant 0 : index
    %95 = vector.load %arg8[%c16_35, %c0_36] : memref<64x128xf32, #tpu.memory_space<vmem>>, vector<8x128xf32>
    tpu.vector_store %arg8[%c16_35, %c0_36], %94 {strides = array<i32>} : memref<64x128xf32, #tpu.memory_space<vmem>>, vector<8x128xf32>,
    %c24 = arith.constant 24 : index
    %c0_37 = arith.constant 0 : index
    %96 = vector.load %arg8[%c24, %c0_37] : memref<64x128xf32, #tpu.memory_space<vmem>>, vector<8x128xf32>
    %97 = arith.truncf %90 : vector<8x32xf32> to vector<8x32xbf16>
    %cst_38 = arith.constant dense<0.000000e+00> : vector<8x128xf32>
    %98 = tpu.matmul %97, %23, %cst_38 {dimension_numbers = #tpu.dot_dimension_numbers<[1], [0], [0], [1], [0, 0, 1, 1], [], []>} : vector<8x32xbf16>, vector<32x128xbf16>, vector<8x128xf32> -> vector<8x128xf32>
    %99 = arith.addf %96, %98 : vector<8x128xf32>
    %100 = arith.mulf %99, %8 : vector<8x128xf32>
    %101 = math.tanh %100 : vector<8x128xf32>
    %102 = arith.mulf %8, %101 : vector<8x128xf32>
    %103 = arith.addf %11, %102 : vector<8x128xf32>
    %104 = vector.extract_strided_slice %103 {offsets = [0, 0], sizes = [8, 32], strides = [1, 1]} : vector<8x128xf32> to vector<8x32xf32>
    %105 = vector.extract_strided_slice %103 {offsets = [0, 32], sizes = [8, 32], strides = [1, 1]} : vector<8x128xf32> to vector<8x32xf32>
    %106 = vector.extract_strided_slice %103 {offsets = [0, 64], sizes = [8, 32], strides = [1, 1]} : vector<8x128xf32> to vector<8x32xf32>
    %107 = vector.extract_strided_slice %103 {offsets = [0, 96], sizes = [8, 32], strides = [1, 1]} : vector<8x128xf32> to vector<8x32xf32>
    %108 = arith.mulf %105, %88 : vector<8x32xf32>
    %109 = arith.mulf %104, %106 : vector<8x32xf32>
    %110 = arith.addf %108, %109 : vector<8x32xf32>
    %111 = math.tanh %110 : vector<8x32xf32>
    %112 = arith.mulf %107, %111 : vector<8x32xf32>
    %113 = arith.truncf %112 : vector<8x32xf32> to vector<8x32xbf16>
    %cst_39 = arith.constant dense<0.000000e+00> : vector<8x128xf32>
    %114 = tpu.matmul %113, %25, %cst_39 {dimension_numbers = #tpu.dot_dimension_numbers<[1], [0], [0], [1], [0, 0, 1, 1], [], []>} : vector<8x32xbf16>, vector<32x128xbf16>, vector<8x128xf32> -> vector<8x128xf32>
    %115 = vector.broadcast %27 : vector<1x128xf32> to vector<8x128xf32>
    %116 = arith.addf %114, %115 : vector<8x128xf32>
    %c24_40 = arith.constant 24 : index
    %c0_41 = arith.constant 0 : index
    %117 = vector.load %arg8[%c24_40, %c0_41] : memref<64x128xf32, #tpu.memory_space<vmem>>, vector<8x128xf32>
    tpu.vector_store %arg8[%c24_40, %c0_41], %116 {strides = array<i32>} : memref<64x128xf32, #tpu.memory_space<vmem>>, vector<8x128xf32>,
    %c32 = arith.constant 32 : index
    %c0_42 = arith.constant 0 : index
    %118 = vector.load %arg8[%c32, %c0_42] : memref<64x128xf32, #tpu.memory_space<vmem>>, vector<8x128xf32>
    %119 = arith.truncf %112 : vector<8x32xf32> to vector<8x32xbf16>
    %cst_43 = arith.constant dense<0.000000e+00> : vector<8x128xf32>
    %120 = tpu.matmul %119, %23, %cst_43 {dimension_numbers = #tpu.dot_dimension_numbers<[1], [0], [0], [1], [0, 0, 1, 1], [], []>} : vector<8x32xbf16>, vector<32x128xbf16>, vector<8x128xf32> -> vector<8x128xf32>
    %121 = arith.addf %118, %120 : vector<8x128xf32>
    %122 = arith.mulf %121, %8 : vector<8x128xf32>
    %123 = math.tanh %122 : vector<8x128xf32>
    %124 = arith.mulf %8, %123 : vector<8x128xf32>
    %125 = arith.addf %11, %124 : vector<8x128xf32>
    %126 = vector.extract_strided_slice %125 {offsets = [0, 0], sizes = [8, 32], strides = [1, 1]} : vector<8x128xf32> to vector<8x32xf32>
    %127 = vector.extract_strided_slice %125 {offsets = [0, 32], sizes = [8, 32], strides = [1, 1]} : vector<8x128xf32> to vector<8x32xf32>
    %128 = vector.extract_strided_slice %125 {offsets = [0, 64], sizes = [8, 32], strides = [1, 1]} : vector<8x128xf32> to vector<8x32xf32>
    %129 = vector.extract_strided_slice %125 {offsets = [0, 96], sizes = [8, 32], strides = [1, 1]} : vector<8x128xf32> to vector<8x32xf32>
    %130 = arith.mulf %127, %110 : vector<8x32xf32>
    %131 = arith.mulf %126, %128 : vector<8x32xf32>
    %132 = arith.addf %130, %131 : vector<8x32xf32>
    %133 = math.tanh %132 : vector<8x32xf32>
    %134 = arith.mulf %129, %133 : vector<8x32xf32>
    %135 = arith.truncf %134 : vector<8x32xf32> to vector<8x32xbf16>
    %cst_44 = arith.constant dense<0.000000e+00> : vector<8x128xf32>
    %136 = tpu.matmul %135, %25, %cst_44 {dimension_numbers = #tpu.dot_dimension_numbers<[1], [0], [0], [1], [0, 0, 1, 1], [], []>} : vector<8x32xbf16>, vector<32x128xbf16>, vector<8x128xf32> -> vector<8x128xf32>
    %137 = vector.broadcast %27 : vector<1x128xf32> to vector<8x128xf32>
    %138 = arith.addf %136, %137 : vector<8x128xf32>
    %c32_45 = arith.constant 32 : index
    %c0_46 = arith.constant 0 : index
    %139 = vector.load %arg8[%c32_45, %c0_46] : memref<64x128xf32, #tpu.memory_space<vmem>>, vector<8x128xf32>
    tpu.vector_store %arg8[%c32_45, %c0_46], %138 {strides = array<i32>} : memref<64x128xf32, #tpu.memory_space<vmem>>, vector<8x128xf32>,
    %c40 = arith.constant 40 : index
    %c0_47 = arith.constant 0 : index
    %140 = vector.load %arg8[%c40, %c0_47] : memref<64x128xf32, #tpu.memory_space<vmem>>, vector<8x128xf32>
    %141 = arith.truncf %134 : vector<8x32xf32> to vector<8x32xbf16>
    %cst_48 = arith.constant dense<0.000000e+00> : vector<8x128xf32>
    %142 = tpu.matmul %141, %23, %cst_48 {dimension_numbers = #tpu.dot_dimension_numbers<[1], [0], [0], [1], [0, 0, 1, 1], [], []>} : vector<8x32xbf16>, vector<32x128xbf16>, vector<8x128xf32> -> vector<8x128xf32>
    %143 = arith.addf %140, %142 : vector<8x128xf32>
    %144 = arith.mulf %143, %8 : vector<8x128xf32>
    %145 = math.tanh %144 : vector<8x128xf32>
    %146 = arith.mulf %8, %145 : vector<8x128xf32>
    %147 = arith.addf %11, %146 : vector<8x128xf32>
    %148 = vector.extract_strided_slice %147 {offsets = [0, 0], sizes = [8, 32], strides = [1, 1]} : vector<8x128xf32> to vector<8x32xf32>
    %149 = vector.extract_strided_slice %147 {offsets = [0, 32], sizes = [8, 32], strides = [1, 1]} : vector<8x128xf32> to vector<8x32xf32>
    %150 = vector.extract_strided_slice %147 {offsets = [0, 64], sizes = [8, 32], strides = [1, 1]} : vector<8x128xf32> to vector<8x32xf32>
    %151 = vector.extract_strided_slice %147 {offsets = [0, 96], sizes = [8, 32], strides = [1, 1]} : vector<8x128xf32> to vector<8x32xf32>
    %152 = arith.mulf %149, %132 : vector<8x32xf32>
    %153 = arith.mulf %148, %150 : vector<8x32xf32>
    %154 = arith.addf %152, %153 : vector<8x32xf32>
    %155 = math.tanh %154 : vector<8x32xf32>
    %156 = arith.mulf %151, %155 : vector<8x32xf32>
    %157 = arith.truncf %156 : vector<8x32xf32> to vector<8x32xbf16>
    %cst_49 = arith.constant dense<0.000000e+00> : vector<8x128xf32>
    %158 = tpu.matmul %157, %25, %cst_49 {dimension_numbers = #tpu.dot_dimension_numbers<[1], [0], [0], [1], [0, 0, 1, 1], [], []>} : vector<8x32xbf16>, vector<32x128xbf16>, vector<8x128xf32> -> vector<8x128xf32>
    %159 = vector.broadcast %27 : vector<1x128xf32> to vector<8x128xf32>
    %160 = arith.addf %158, %159 : vector<8x128xf32>
    %c40_50 = arith.constant 40 : index
    %c0_51 = arith.constant 0 : index
    %161 = vector.load %arg8[%c40_50, %c0_51] : memref<64x128xf32, #tpu.memory_space<vmem>>, vector<8x128xf32>
    tpu.vector_store %arg8[%c40_50, %c0_51], %160 {strides = array<i32>} : memref<64x128xf32, #tpu.memory_space<vmem>>, vector<8x128xf32>,
    %c48 = arith.constant 48 : index
    %c0_52 = arith.constant 0 : index
    %162 = vector.load %arg8[%c48, %c0_52] : memref<64x128xf32, #tpu.memory_space<vmem>>, vector<8x128xf32>
    %163 = arith.truncf %156 : vector<8x32xf32> to vector<8x32xbf16>
    %cst_53 = arith.constant dense<0.000000e+00> : vector<8x128xf32>
    %164 = tpu.matmul %163, %23, %cst_53 {dimension_numbers = #tpu.dot_dimension_numbers<[1], [0], [0], [1], [0, 0, 1, 1], [], []>} : vector<8x32xbf16>, vector<32x128xbf16>, vector<8x128xf32> -> vector<8x128xf32>
    %165 = arith.addf %162, %164 : vector<8x128xf32>
    %166 = arith.mulf %165, %8 : vector<8x128xf32>
    %167 = math.tanh %166 : vector<8x128xf32>
    %168 = arith.mulf %8, %167 : vector<8x128xf32>
    %169 = arith.addf %11, %168 : vector<8x128xf32>
    %170 = vector.extract_strided_slice %169 {offsets = [0, 0], sizes = [8, 32], strides = [1, 1]} : vector<8x128xf32> to vector<8x32xf32>
    %171 = vector.extract_strided_slice %169 {offsets = [0, 32], sizes = [8, 32], strides = [1, 1]} : vector<8x128xf32> to vector<8x32xf32>
    %172 = vector.extract_strided_slice %169 {offsets = [0, 64], sizes = [8, 32], strides = [1, 1]} : vector<8x128xf32> to vector<8x32xf32>
    %173 = vector.extract_strided_slice %169 {offsets = [0, 96], sizes = [8, 32], strides = [1, 1]} : vector<8x128xf32> to vector<8x32xf32>
    %174 = arith.mulf %171, %154 : vector<8x32xf32>
    %175 = arith.mulf %170, %172 : vector<8x32xf32>
    %176 = arith.addf %174, %175 : vector<8x32xf32>
    %177 = math.tanh %176 : vector<8x32xf32>
    %178 = arith.mulf %173, %177 : vector<8x32xf32>
    %179 = arith.truncf %178 : vector<8x32xf32> to vector<8x32xbf16>
    %cst_54 = arith.constant dense<0.000000e+00> : vector<8x128xf32>
    %180 = tpu.matmul %179, %25, %cst_54 {dimension_numbers = #tpu.dot_dimension_numbers<[1], [0], [0], [1], [0, 0, 1, 1], [], []>} : vector<8x32xbf16>, vector<32x128xbf16>, vector<8x128xf32> -> vector<8x128xf32>
    %181 = vector.broadcast %27 : vector<1x128xf32> to vector<8x128xf32>
    %182 = arith.addf %180, %181 : vector<8x128xf32>
    %c48_55 = arith.constant 48 : index
    %c0_56 = arith.constant 0 : index
    %183 = vector.load %arg8[%c48_55, %c0_56] : memref<64x128xf32, #tpu.memory_space<vmem>>, vector<8x128xf32>
    tpu.vector_store %arg8[%c48_55, %c0_56], %182 {strides = array<i32>} : memref<64x128xf32, #tpu.memory_space<vmem>>, vector<8x128xf32>,
    %c56 = arith.constant 56 : index
    %c0_57 = arith.constant 0 : index
    %184 = vector.load %arg8[%c56, %c0_57] : memref<64x128xf32, #tpu.memory_space<vmem>>, vector<8x128xf32>
    %185 = arith.truncf %178 : vector<8x32xf32> to vector<8x32xbf16>
    %cst_58 = arith.constant dense<0.000000e+00> : vector<8x128xf32>
    %186 = tpu.matmul %185, %23, %cst_58 {dimension_numbers = #tpu.dot_dimension_numbers<[1], [0], [0], [1], [0, 0, 1, 1], [], []>} : vector<8x32xbf16>, vector<32x128xbf16>, vector<8x128xf32> -> vector<8x128xf32>
    %187 = arith.addf %184, %186 : vector<8x128xf32>
    %188 = arith.mulf %187, %8 : vector<8x128xf32>
    %189 = math.tanh %188 : vector<8x128xf32>
    %190 = arith.mulf %8, %189 : vector<8x128xf32>
    %191 = arith.addf %11, %190 : vector<8x128xf32>
    %192 = vector.extract_strided_slice %191 {offsets = [0, 0], sizes = [8, 32], strides = [1, 1]} : vector<8x128xf32> to vector<8x32xf32>
    %193 = vector.extract_strided_slice %191 {offsets = [0, 32], sizes = [8, 32], strides = [1, 1]} : vector<8x128xf32> to vector<8x32xf32>
    %194 = vector.extract_strided_slice %191 {offsets = [0, 64], sizes = [8, 32], strides = [1, 1]} : vector<8x128xf32> to vector<8x32xf32>
    %195 = vector.extract_strided_slice %191 {offsets = [0, 96], sizes = [8, 32], strides = [1, 1]} : vector<8x128xf32> to vector<8x32xf32>
    %196 = arith.mulf %193, %176 : vector<8x32xf32>
    %197 = arith.mulf %192, %194 : vector<8x32xf32>
    %198 = arith.addf %196, %197 : vector<8x32xf32>
    %199 = math.tanh %198 : vector<8x32xf32>
    %200 = arith.mulf %195, %199 : vector<8x32xf32>
    %201 = arith.truncf %200 : vector<8x32xf32> to vector<8x32xbf16>
    %cst_59 = arith.constant dense<0.000000e+00> : vector<8x128xf32>
    %202 = tpu.matmul %201, %25, %cst_59 {dimension_numbers = #tpu.dot_dimension_numbers<[1], [0], [0], [1], [0, 0, 1, 1], [], []>} : vector<8x32xbf16>, vector<32x128xbf16>, vector<8x128xf32> -> vector<8x128xf32>
    %203 = vector.broadcast %27 : vector<1x128xf32> to vector<8x128xf32>
    %204 = arith.addf %202, %203 : vector<8x128xf32>
    %c56_60 = arith.constant 56 : index
    %c0_61 = arith.constant 0 : index
    %205 = vector.load %arg8[%c56_60, %c0_61] : memref<64x128xf32, #tpu.memory_space<vmem>>, vector<8x128xf32>
    tpu.vector_store %arg8[%c56_60, %c0_61], %204 {strides = array<i32>} : memref<64x128xf32, #tpu.memory_space<vmem>>, vector<8x128xf32>,
    %c1_62 = arith.constant 1 : index
    %c0_63 = arith.constant 0 : index
    %c0_64 = arith.constant 0 : index
    %206 = vector.load %arg3[%c1_62, %c0_63, %c0_64] : memref<2x32x128xbf16, #tpu.memory_space<vmem>>, vector<1x32x128xbf16>
    %207 = vector.shape_cast %206 : vector<1x32x128xbf16> to vector<32x128xbf16>
    %cst_65 = arith.constant 0.000000e+00 : f32
    %208 = vector.broadcast %cst_65 : f32 to vector<8x32xf32>
    %cst_66 = arith.constant 0.000000e+00 : f32
    %209 = vector.broadcast %cst_66 : f32 to vector<8x32xf32>
    %c0_67 = arith.constant 0 : index
    %c0_68 = arith.constant 0 : index
    %210 = vector.load %arg8[%c0_67, %c0_68] : memref<64x128xf32, #tpu.memory_space<vmem>>, vector<8x128xf32>
    %211 = arith.truncf %208 : vector<8x32xf32> to vector<8x32xbf16>
    %cst_69 = arith.constant dense<0.000000e+00> : vector<8x128xf32>
    %212 = tpu.matmul %211, %207, %cst_69 {dimension_numbers = #tpu.dot_dimension_numbers<[1], [0], [0], [1], [0, 0, 1, 1], [], []>} : vector<8x32xbf16>, vector<32x128xbf16>, vector<8x128xf32> -> vector<8x128xf32>
    %213 = arith.addf %210, %212 : vector<8x128xf32>
    %214 = arith.mulf %213, %8 : vector<8x128xf32>
    %215 = math.tanh %214 : vector<8x128xf32>
    %216 = arith.mulf %8, %215 : vector<8x128xf32>
    %217 = arith.addf %11, %216 : vector<8x128xf32>
    %218 = vector.extract_strided_slice %217 {offsets = [0, 0], sizes = [8, 32], strides = [1, 1]} : vector<8x128xf32> to vector<8x32xf32>
    %219 = vector.extract_strided_slice %217 {offsets = [0, 32], sizes = [8, 32], strides = [1, 1]} : vector<8x128xf32> to vector<8x32xf32>
    %220 = vector.extract_strided_slice %217 {offsets = [0, 64], sizes = [8, 32], strides = [1, 1]} : vector<8x128xf32> to vector<8x32xf32>
    %221 = vector.extract_strided_slice %217 {offsets = [0, 96], sizes = [8, 32], strides = [1, 1]} : vector<8x128xf32> to vector<8x32xf32>
    %222 = arith.mulf %219, %209 : vector<8x32xf32>
    %223 = arith.mulf %218, %220 : vector<8x32xf32>
    %224 = arith.addf %222, %223 : vector<8x32xf32>
    %225 = math.tanh %224 : vector<8x32xf32>
    %226 = arith.mulf %221, %225 : vector<8x32xf32>
    %c8_70 = arith.constant 8 : index
    %c0_71 = arith.constant 0 : index
    %227 = vector.load %arg8[%c8_70, %c0_71] : memref<64x128xf32, #tpu.memory_space<vmem>>, vector<8x128xf32>
    %228 = arith.truncf %226 : vector<8x32xf32> to vector<8x32xbf16>
    %cst_72 = arith.constant dense<0.000000e+00> : vector<8x128xf32>
    %229 = tpu.matmul %228, %207, %cst_72 {dimension_numbers = #tpu.dot_dimension_numbers<[1], [0], [0], [1], [0, 0, 1, 1], [], []>} : vector<8x32xbf16>, vector<32x128xbf16>, vector<8x128xf32> -> vector<8x128xf32>
    %230 = arith.addf %227, %229 : vector<8x128xf32>
    %231 = arith.mulf %230, %8 : vector<8x128xf32>
    %232 = math.tanh %231 : vector<8x128xf32>
    %233 = arith.mulf %8, %232 : vector<8x128xf32>
    %234 = arith.addf %11, %233 : vector<8x128xf32>
    %235 = vector.extract_strided_slice %234 {offsets = [0, 0], sizes = [8, 32], strides = [1, 1]} : vector<8x128xf32> to vector<8x32xf32>
    %236 = vector.extract_strided_slice %234 {offsets = [0, 32], sizes = [8, 32], strides = [1, 1]} : vector<8x128xf32> to vector<8x32xf32>
    %237 = vector.extract_strided_slice %234 {offsets = [0, 64], sizes = [8, 32], strides = [1, 1]} : vector<8x128xf32> to vector<8x32xf32>
    %238 = vector.extract_strided_slice %234 {offsets = [0, 96], sizes = [8, 32], strides = [1, 1]} : vector<8x128xf32> to vector<8x32xf32>
    %239 = arith.mulf %236, %224 : vector<8x32xf32>
    %240 = arith.mulf %235, %237 : vector<8x32xf32>
    %241 = arith.addf %239, %240 : vector<8x32xf32>
    %242 = math.tanh %241 : vector<8x32xf32>
    %243 = arith.mulf %238, %242 : vector<8x32xf32>
    %c16_73 = arith.constant 16 : index
    %c0_74 = arith.constant 0 : index
    %244 = vector.load %arg8[%c16_73, %c0_74] : memref<64x128xf32, #tpu.memory_space<vmem>>, vector<8x128xf32>
    %245 = arith.truncf %243 : vector<8x32xf32> to vector<8x32xbf16>
    %cst_75 = arith.constant dense<0.000000e+00> : vector<8x128xf32>
    %246 = tpu.matmul %245, %207, %cst_75 {dimension_numbers = #tpu.dot_dimension_numbers<[1], [0], [0], [1], [0, 0, 1, 1], [], []>} : vector<8x32xbf16>, vector<32x128xbf16>, vector<8x128xf32> -> vector<8x128xf32>
    %247 = arith.addf %244, %246 : vector<8x128xf32>
    %248 = arith.mulf %247, %8 : vector<8x128xf32>
    %249 = math.tanh %248 : vector<8x128xf32>
    %250 = arith.mulf %8, %249 : vector<8x128xf32>
    %251 = arith.addf %11, %250 : vector<8x128xf32>
    %252 = vector.extract_strided_slice %251 {offsets = [0, 0], sizes = [8, 32], strides = [1, 1]} : vector<8x128xf32> to vector<8x32xf32>
    %253 = vector.extract_strided_slice %251 {offsets = [0, 32], sizes = [8, 32], strides = [1, 1]} : vector<8x128xf32> to vector<8x32xf32>
    %254 = vector.extract_strided_slice %251 {offsets = [0, 64], sizes = [8, 32], strides = [1, 1]} : vector<8x128xf32> to vector<8x32xf32>
    %255 = vector.extract_strided_slice %251 {offsets = [0, 96], sizes = [8, 32], strides = [1, 1]} : vector<8x128xf32> to vector<8x32xf32>
    %256 = arith.mulf %253, %241 : vector<8x32xf32>
    %257 = arith.mulf %252, %254 : vector<8x32xf32>
    %258 = arith.addf %256, %257 : vector<8x32xf32>
    %259 = math.tanh %258 : vector<8x32xf32>
    %260 = arith.mulf %255, %259 : vector<8x32xf32>
    %c24_76 = arith.constant 24 : index
    %c0_77 = arith.constant 0 : index
    %261 = vector.load %arg8[%c24_76, %c0_77] : memref<64x128xf32, #tpu.memory_space<vmem>>, vector<8x128xf32>
    %262 = arith.truncf %260 : vector<8x32xf32> to vector<8x32xbf16>
    %cst_78 = arith.constant dense<0.000000e+00> : vector<8x128xf32>
    %263 = tpu.matmul %262, %207, %cst_78 {dimension_numbers = #tpu.dot_dimension_numbers<[1], [0], [0], [1], [0, 0, 1, 1], [], []>} : vector<8x32xbf16>, vector<32x128xbf16>, vector<8x128xf32> -> vector<8x128xf32>
    %264 = arith.addf %261, %263 : vector<8x128xf32>
    %265 = arith.mulf %264, %8 : vector<8x128xf32>
    %266 = math.tanh %265 : vector<8x128xf32>
    %267 = arith.mulf %8, %266 : vector<8x128xf32>
    %268 = arith.addf %11, %267 : vector<8x128xf32>
    %269 = vector.extract_strided_slice %268 {offsets = [0, 0], sizes = [8, 32], strides = [1, 1]} : vector<8x128xf32> to vector<8x32xf32>
    %270 = vector.extract_strided_slice %268 {offsets = [0, 32], sizes = [8, 32], strides = [1, 1]} : vector<8x128xf32> to vector<8x32xf32>
    %271 = vector.extract_strided_slice %268 {offsets = [0, 64], sizes = [8, 32], strides = [1, 1]} : vector<8x128xf32> to vector<8x32xf32>
    %272 = vector.extract_strided_slice %268 {offsets = [0, 96], sizes = [8, 32], strides = [1, 1]} : vector<8x128xf32> to vector<8x32xf32>
    %273 = arith.mulf %270, %258 : vector<8x32xf32>
    %274 = arith.mulf %269, %271 : vector<8x32xf32>
    %275 = arith.addf %273, %274 : vector<8x32xf32>
    %276 = math.tanh %275 : vector<8x32xf32>
    %277 = arith.mulf %272, %276 : vector<8x32xf32>
    %c32_79 = arith.constant 32 : index
    %c0_80 = arith.constant 0 : index
    %278 = vector.load %arg8[%c32_79, %c0_80] : memref<64x128xf32, #tpu.memory_space<vmem>>, vector<8x128xf32>
    %279 = arith.truncf %277 : vector<8x32xf32> to vector<8x32xbf16>
    %cst_81 = arith.constant dense<0.000000e+00> : vector<8x128xf32>
    %280 = tpu.matmul %279, %207, %cst_81 {dimension_numbers = #tpu.dot_dimension_numbers<[1], [0], [0], [1], [0, 0, 1, 1], [], []>} : vector<8x32xbf16>, vector<32x128xbf16>, vector<8x128xf32> -> vector<8x128xf32>
    %281 = arith.addf %278, %280 : vector<8x128xf32>
    %282 = arith.mulf %281, %8 : vector<8x128xf32>
    %283 = math.tanh %282 : vector<8x128xf32>
    %284 = arith.mulf %8, %283 : vector<8x128xf32>
    %285 = arith.addf %11, %284 : vector<8x128xf32>
    %286 = vector.extract_strided_slice %285 {offsets = [0, 0], sizes = [8, 32], strides = [1, 1]} : vector<8x128xf32> to vector<8x32xf32>
    %287 = vector.extract_strided_slice %285 {offsets = [0, 32], sizes = [8, 32], strides = [1, 1]} : vector<8x128xf32> to vector<8x32xf32>
    %288 = vector.extract_strided_slice %285 {offsets = [0, 64], sizes = [8, 32], strides = [1, 1]} : vector<8x128xf32> to vector<8x32xf32>
    %289 = vector.extract_strided_slice %285 {offsets = [0, 96], sizes = [8, 32], strides = [1, 1]} : vector<8x128xf32> to vector<8x32xf32>
    %290 = arith.mulf %287, %275 : vector<8x32xf32>
    %291 = arith.mulf %286, %288 : vector<8x32xf32>
    %292 = arith.addf %290, %291 : vector<8x32xf32>
    %293 = math.tanh %292 : vector<8x32xf32>
    %294 = arith.mulf %289, %293 : vector<8x32xf32>
    %c40_82 = arith.constant 40 : index
    %c0_83 = arith.constant 0 : index
    %295 = vector.load %arg8[%c40_82, %c0_83] : memref<64x128xf32, #tpu.memory_space<vmem>>, vector<8x128xf32>
    %296 = arith.truncf %294 : vector<8x32xf32> to vector<8x32xbf16>
    %cst_84 = arith.constant dense<0.000000e+00> : vector<8x128xf32>
    %297 = tpu.matmul %296, %207, %cst_84 {dimension_numbers = #tpu.dot_dimension_numbers<[1], [0], [0], [1], [0, 0, 1, 1], [], []>} : vector<8x32xbf16>, vector<32x128xbf16>, vector<8x128xf32> -> vector<8x128xf32>
    %298 = arith.addf %295, %297 : vector<8x128xf32>
    %299 = arith.mulf %298, %8 : vector<8x128xf32>
    %300 = math.tanh %299 : vector<8x128xf32>
    %301 = arith.mulf %8, %300 : vector<8x128xf32>
    %302 = arith.addf %11, %301 : vector<8x128xf32>
    %303 = vector.extract_strided_slice %302 {offsets = [0, 0], sizes = [8, 32], strides = [1, 1]} : vector<8x128xf32> to vector<8x32xf32>
    %304 = vector.extract_strided_slice %302 {offsets = [0, 32], sizes = [8, 32], strides = [1, 1]} : vector<8x128xf32> to vector<8x32xf32>
    %305 = vector.extract_strided_slice %302 {offsets = [0, 64], sizes = [8, 32], strides = [1, 1]} : vector<8x128xf32> to vector<8x32xf32>
    %306 = vector.extract_strided_slice %302 {offsets = [0, 96], sizes = [8, 32], strides = [1, 1]} : vector<8x128xf32> to vector<8x32xf32>
    %307 = arith.mulf %304, %292 : vector<8x32xf32>
    %308 = arith.mulf %303, %305 : vector<8x32xf32>
    %309 = arith.addf %307, %308 : vector<8x32xf32>
    %310 = math.tanh %309 : vector<8x32xf32>
    %311 = arith.mulf %306, %310 : vector<8x32xf32>
    %c48_85 = arith.constant 48 : index
    %c0_86 = arith.constant 0 : index
    %312 = vector.load %arg8[%c48_85, %c0_86] : memref<64x128xf32, #tpu.memory_space<vmem>>, vector<8x128xf32>
    %313 = arith.truncf %311 : vector<8x32xf32> to vector<8x32xbf16>
    %cst_87 = arith.constant dense<0.000000e+00> : vector<8x128xf32>
    %314 = tpu.matmul %313, %207, %cst_87 {dimension_numbers = #tpu.dot_dimension_numbers<[1], [0], [0], [1], [0, 0, 1, 1], [], []>} : vector<8x32xbf16>, vector<32x128xbf16>, vector<8x128xf32> -> vector<8x128xf32>
    %315 = arith.addf %312, %314 : vector<8x128xf32>
    %316 = arith.mulf %315, %8 : vector<8x128xf32>
    %317 = math.tanh %316 : vector<8x128xf32>
    %318 = arith.mulf %8, %317 : vector<8x128xf32>
    %319 = arith.addf %11, %318 : vector<8x128xf32>
    %320 = vector.extract_strided_slice %319 {offsets = [0, 0], sizes = [8, 32], strides = [1, 1]} : vector<8x128xf32> to vector<8x32xf32>
    %321 = vector.extract_strided_slice %319 {offsets = [0, 32], sizes = [8, 32], strides = [1, 1]} : vector<8x128xf32> to vector<8x32xf32>
    %322 = vector.extract_strided_slice %319 {offsets = [0, 64], sizes = [8, 32], strides = [1, 1]} : vector<8x128xf32> to vector<8x32xf32>
    %323 = vector.extract_strided_slice %319 {offsets = [0, 96], sizes = [8, 32], strides = [1, 1]} : vector<8x128xf32> to vector<8x32xf32>
    %324 = arith.mulf %321, %309 : vector<8x32xf32>
    %325 = arith.mulf %320, %322 : vector<8x32xf32>
    %326 = arith.addf %324, %325 : vector<8x32xf32>
    %327 = math.tanh %326 : vector<8x32xf32>
    %328 = arith.mulf %323, %327 : vector<8x32xf32>
    %c56_88 = arith.constant 56 : index
    %c0_89 = arith.constant 0 : index
    %329 = vector.load %arg8[%c56_88, %c0_89] : memref<64x128xf32, #tpu.memory_space<vmem>>, vector<8x128xf32>
    %330 = arith.truncf %328 : vector<8x32xf32> to vector<8x32xbf16>
    %cst_90 = arith.constant dense<0.000000e+00> : vector<8x128xf32>
    %331 = tpu.matmul %330, %207, %cst_90 {dimension_numbers = #tpu.dot_dimension_numbers<[1], [0], [0], [1], [0, 0, 1, 1], [], []>} : vector<8x32xbf16>, vector<32x128xbf16>, vector<8x128xf32> -> vector<8x128xf32>
    %332 = arith.addf %329, %331 : vector<8x128xf32>
    %333 = arith.mulf %332, %8 : vector<8x128xf32>
    %334 = math.tanh %333 : vector<8x128xf32>
    %335 = arith.mulf %8, %334 : vector<8x128xf32>
    %336 = arith.addf %11, %335 : vector<8x128xf32>
    %337 = vector.extract_strided_slice %336 {offsets = [0, 0], sizes = [8, 32], strides = [1, 1]} : vector<8x128xf32> to vector<8x32xf32>
    %338 = vector.extract_strided_slice %336 {offsets = [0, 32], sizes = [8, 32], strides = [1, 1]} : vector<8x128xf32> to vector<8x32xf32>
    %339 = vector.extract_strided_slice %336 {offsets = [0, 64], sizes = [8, 32], strides = [1, 1]} : vector<8x128xf32> to vector<8x32xf32>
    %340 = vector.extract_strided_slice %336 {offsets = [0, 96], sizes = [8, 32], strides = [1, 1]} : vector<8x128xf32> to vector<8x32xf32>
    %341 = arith.mulf %338, %326 : vector<8x32xf32>
    %342 = arith.mulf %337, %339 : vector<8x32xf32>
    %343 = arith.addf %341, %342 : vector<8x32xf32>
    %344 = math.tanh %343 : vector<8x32xf32>
    %345 = arith.mulf %340, %344 : vector<8x32xf32>
    %c0_91 = arith.constant 0 : index
    %c0_92 = arith.constant 0 : index
    %346 = vector.load %arg5[%c0_91, %c0_92] : memref<1x32xf32, #tpu.memory_space<vmem>>, vector<1x32xf32>
    %347 = vector.broadcast %346 : vector<1x32xf32> to vector<8x32xf32>
    %348 = arith.mulf %345, %347 : vector<8x32xf32>
    %cst_93 = arith.constant dense<0.000000e+00> : vector<8xf32>
    %349 = vector.multi_reduction <add>, %348, %cst_93 [1] : vector<8x32xf32> to vector<8xf32>
    %350 = vector.shape_cast %349 : vector<8xf32> to vector<8x1xf32>
    %c0_94 = arith.constant 0 : index
    %c0_95 = arith.constant 0 : index
    %351 = vector.load %arg6[%c0_94, %c0_95] : memref<1x1xf32, #tpu.memory_space<vmem>>, vector<1x1xf32>
    %352 = vector.broadcast %351 : vector<1x1xf32> to vector<8x1xf32>
    %353 = arith.addf %350, %352 : vector<8x1xf32>
    %c0_96 = arith.constant 0 : index
    %c0_97 = arith.constant 0 : index
    %354 = vector.load %arg7[%c0_96, %c0_97] : memref<8x1xf32, #tpu.memory_space<vmem>>, vector<8x1xf32>
    tpu.vector_store %arg7[%c0_96, %c0_97], %353 {strides = array<i32>} : memref<8x1xf32, #tpu.memory_space<vmem>>, vector<8x1xf32>,
    return
  }
}

</mosaic_0001>

<bundles_post_ra>
// kernel: tpu_custom_call.1
= control target key start
LH: loop header
LB: loop body
LE: loop exit
PB: predicated region body
PF: predicated region fallthrough
CT: control target
= control target key end

     0   :  { %v2064_v0 = vmov 0.0   ;;  %vm2065_vm0 = vmmov 0   ;;  %v2066_v2 = vmov 0   ;;  %v29_v5 = vlaneseq  ;;  %s2069_s11 = smov 32   ;;  %s2070_s12 = smov 96   ;;  %s2512_s3 = inlined_call_operand.vmem [shape: bf16[2,32,128], index: 3, kind: input, shape index: {}]   ;;  %s2513_s0 = inlined_call_operand.vmem [shape: f32[64,1], index: 0, kind: input, shape index: {}]   ;;  %s2514_s1 = inlined_call_operand.vmem [shape: f32[1,128], index: 1, kind: input, shape index: {}]   ;;  %s2515_s4 = inlined_call_operand.vmem [shape: f32[2,1,128], index: 4, kind: input, shape index: {}]   ;;  %s2516_s2 = inlined_call_operand.vmem [shape: bf16[1,32,128], index: 2, kind: input, shape index: {}]   ;;  %s2517_s5 = inlined_call_operand.vmem [shape: f32[1,32], index: 5, kind: input, shape index: {}]   ;;  %s2518_s6 = inlined_call_operand.<no memory space> [shape: f32[1,1], index: 6, kind: input, shape index: {}]   ;;  %s2519_s7 = inlined_call_operand.vmem [shape: f32[8,1], index: 7, kind: output, shape index: {}]  }
   0x1   :  { %1765 = vmatprep.subr.bf16.mxu0 %v2064_v0  ;;  %v2115_v1 = vld [vmem:[%s2512_s3] sm:$0xff]   ;;  %1769 = vmatprep.mubr.msk.bf16.mxu0 %vm2065_vm0, %v2064_v0  ;;  %v2125_v3 = vld [vmem:[%s2512_s3 + $0x8] sm:$0xff]   ;;  %v2067_v12 = vmov 0.5   ;;  %vm145_vm4 = vcmask 261120   ;;  %v38_v59 = vld [vmem:[%s2513_s0 + $0x10] sm:$0xff]  ;;  %vm1649_vm5 = vcmask 7168  }
   0x2   :  { %1992 = vset.pattern.permute.xlu0 %v2066_v2  ;;  %1993 = vset.pattern.permute.xlu1 %v2066_v2  ;;  %v36_v4 = vld [vmem:[%s2513_s0] sm:$0xff]  ;;  %v30_v8 = vand.u32 127, %v29_v5  ;;  %v2169_v30 = vld [vmem:[%s2516_s2 + $0x8] sm:$0xff]  }
   0x3   :  { %1766 = vmatpush3.bf16.msra.mxu0 %v2115_v1  ;;  %1837 = vmatprep.subr.bf16.mxu1 %v2064_v0  ;;  %v2142_v6 = vld [vmem:[%s2514_s1] ss:$0 sm:$0xff]  ;;  %s2068_s1 = smov 64   ;;  %v37_v33 = vld [vmem:[%s2513_s0 + $0x8] sm:$0xff] }
   0x4   :  { %1767 = vmatprep.subr.bf16.mxu0 %v2064_v0  ;;  %47 = vperm.xlu0 %1992, %v36_v4   ;;  %vm31_vm1 = vcmp.ge.s32.totalorder %v30_v8, 64  ;;  %vm32_vm2 = vcmp.lt.s32.totalorder %v30_v8, 96  ;;  %v2148_v10 = vld [vmem:[%s2515_s4] ss:$0 sm:$0xff] }
   0x5   :  { %1841 = vmatprep.mubr.msk.bf16.mxu1 %vm2065_vm0, %v2064_v0  ;;  %vm33_vm3 = vmand %vm31_vm1, %vm32_vm2  ;;  %v2163_v29 = vld [vmem:[%s2516_s2] sm:$0xff]  }
   0x6   :  { %v2151_v13 = vsel %vm33_vm3, 1.0, %v2067_v12  ;;  %v2154_v21 = vsel %vm33_vm3, 0.0, %v2067_v12  ;;  %1838 = vmatpush3.bf16.msra.mxu1 %v2163_v29 }
   0x7   :  { %1768 = vmatpush3.bf16.msra.mxu0 %v2125_v3  ;;  %1839 = vmatprep.subr.bf16.mxu1 %v2064_v0 }
   0x8   :  { %1773 = vmatprep.subr.bf16.mxu0 %v2064_v0 }
   0xa   :  { %1770 = vmatmul.mubr.bf16.vlgmr.msra.gmra.mrb[0].mxu0 %v2066_v2  ;;  %1840 = vmatpush3.bf16.msra.mxu1 %v2169_v30 }
   0xb   :  { %1777 = vmatprep.mubr.msk.bf16.mxu0 %vm2065_vm0, %v2064_v0  ;;  %1774 = vmatpush3.bf16.msra.mxu0 %v2163_v29 }
   0xc   :  { %1775 = vmatprep.subr.bf16.mxu0 %v2064_v0  ;;  %1853 = vmatprep.subr.bf16.mxu1 %v2064_v0 }
   0xf   :  { %1776 = vmatpush3.bf16.msra.mxu0 %v2169_v30 }
  0x10   :  { %1781 = vmatprep.subr.bf16.mxu0 %v2064_v0 }
  0x83   :  { %v48_v7 = vpop.permute.xlu0 %47 }
  0x84   :  { %v91_v9 = vmul.f32 %v2142_v6, %v48_v7 }
  0x86   :  { %v106_v11 = vadd.f32 %v2148_v10, %v91_v9 }
  0xdd   :  { %v183_v14 = vpop.f32.mrb[0].mxu0 }
  0xde   :  { %v189_v15 = vadd.f32 %v183_v14, %v106_v11  ;;  %v1771_v16 = vpop.f32.mrb[1].mxu0 }
  0xdf   :  { %v186_v17 = vpop.f32.mrb[2].mxu0 }
  0xe0   :  { %v190_v18 = vmul.f32 %v189_v15, %v2151_v13  ;;  %v1772_v19 = vpop.f32.mrb[3].mxu0 }
  0xe2   :  { %2000 = vtanh.f32 %v190_v18 }
  0xec   :  { %v2001_v20 = vpop.eup %2000 }
  0xed   :  { %v192_v22 = vmul.f32 %v2001_v20, %v2151_v13 }
  0xef   :  { %v193_v23 = vadd.f32 %v192_v22, %v2154_v21 }
  0xf1   :  { %196 = vrot.lane.b32.xlu0 %v193_v23, %s2068_s1  ;;  %v194_v26 = vmul.f32 0.0, %v193_v23 }
 0x163   :  { %v197_v24 = vpop.permute.xlu0 %196 }
 0x164   :  { %v199_v25 = vmul.f32 %v197_v24, %v193_v23 }
 0x166   :  { %201 = vrot.lane.b32.xlu1 %v199_v25, %s2069_s11 }
 0x1d8   :  { %v202_v27 = vpop.permute.xlu1 %201 }
 0x1d9   :  { %v204_v28 = vadd.f32 %v202_v27, %v194_v26 }
 0x1db   :  { %2002 = vtanh.f32 %v204_v28 }
 0x1e5   :  { %v2003_v31 = vpop.eup %2002 }
 0x1e6   :  { %207 = vrot.lane.b32.xlu1 %v2003_v31, %s2068_s1 }
 0x1ea   :  { %52 = vperm.xlu1 %1993, %v37_v33  }
 0x258   :  { %v208_v32 = vpop.permute.xlu1 %207 }
 0x259   :  { %v210_v34 = vmul.f32 %v208_v32, %v193_v23  ;;  %v39_v32 = vld [vmem:[%s2513_s0 + $0x18] sm:$0xff] }
 0x25b   :  { %v211_v35 = vpack.c.bf16 %v210_v34, %v210_v34 }
 0x25d   :  { %219 = vrot.lane.b32.xlu0 %v211_v35, %s2069_s11 }
 0x269   :  { %v53_v37 = vpop.permute.xlu1 %52 }
 0x26a   :  { %v92_v40 = vmul.f32 %v2142_v6, %v53_v37 }
 0x26c   :  { %v107_v43 = vadd.f32 %v2148_v10, %v92_v40 }
 0x2cf   :  { %v220_v36 = vpop.permute.xlu0 %219 }
 0x2d0   :  { %1778 = vmatmul.mubr.msk.bf16.vlgmr.msra.gmra.mrb[4].mxu0 %vm145_vm4, %v220_v36 }
 0x2d1   :  { %1782 = vmatpush3.bf16.msra.mxu0 %v2115_v1  ;;  %1785 = vmatprep.mubr.msk.bf16.mxu0 %vm2065_vm0, %v2064_v0 }
 0x2d2   :  { %1783 = vmatprep.subr.bf16.mxu0 %v2064_v0 }
 0x2d5   :  { %1784 = vmatpush3.bf16.msra.mxu0 %v2125_v3 }
 0x2d6   :  { %1789 = vmatprep.subr.bf16.mxu0 %v2064_v0 }
 0x2d8   :  { %1786 = vmatmul.mubr.msk.bf16.vlgmr.msra.gmra.mrb[8].mxu0 %vm145_vm4, %v220_v36 }
 0x2d9   :  { %1790 = vmatpush3.bf16.msra.mxu0 %v2163_v29  ;;  %1793 = vmatprep.mubr.msk.bf16.mxu0 %vm2065_vm0, %v2064_v0 }
 0x2da   :  { %1791 = vmatprep.subr.bf16.mxu0 %v2064_v0 }
 0x2dd   :  { %1792 = vmatpush3.bf16.msra.mxu0 %v2169_v30 }
 0x2de   :  { %1797 = vmatprep.subr.bf16.mxu0 %v2064_v0 }
 0x3a3   :  { %v2197_v38 = vpop.f32.mrb[4].mxu0 }
 0x3a4   :  { %v1779_v39 = vpop.f32.mrb[5].mxu0 }
 0x3a5   :  { %v273_v41 = vpop.f32.mrb[6].mxu0 }
 0x3a6   :  { %v1780_v42 = vpop.f32.mrb[7].mxu0 }
 0x3ab   :  { %v312_v44 = vpop.f32.mrb[8].mxu0 }
 0x3ac   :  { %v318_v45 = vadd.f32 %v312_v44, %v107_v43  ;;  %v1787_v46 = vpop.f32.mrb[9].mxu0 }
 0x3ad   :  { %v315_v47 = vpop.f32.mrb[10].mxu0 }
 0x3ae   :  { %v319_v48 = vmul.f32 %v318_v45, %v2151_v13  ;;  %v1788_v49 = vpop.f32.mrb[11].mxu0 }
 0x3b0   :  { %2004 = vtanh.f32 %v319_v48 }
 0x3ba   :  { %v2005_v50 = vpop.eup %2004 }
 0x3bb   :  { %v321_v51 = vmul.f32 %v2005_v50, %v2151_v13 }
 0x3bd   :  { %v322_v52 = vadd.f32 %v321_v51, %v2154_v21 }
 0x3bf   :  { %325 = vrot.lane.b32.xlu0 %v322_v52, %s2068_s1  ;;  %v323_v55 = vmul.f32 %v322_v52, %v204_v28 }
 0x431   :  { %v326_v53 = vpop.permute.xlu0 %325 }
 0x432   :  { %v328_v54 = vmul.f32 %v326_v53, %v322_v52 }
 0x434   :  { %330 = vrot.lane.b32.xlu1 %v328_v54, %s2069_s11 }
 0x4a6   :  { %v331_v56 = vpop.permute.xlu1 %330 }
 0x4a7   :  { %v333_v57 = vadd.f32 %v331_v56, %v323_v55 }
 0x4a9   :  { %2006 = vtanh.f32 %v333_v57 }
 0x4b3   :  { %v2007_v58 = vpop.eup %2006 }
 0x4b4   :  { %336 = vrot.lane.b32.xlu0 %v2007_v58, %s2068_s1 }
 0x4b8   :  { %57 = vperm.xlu0 %1992, %v38_v59  }
 0x526   :  { %v337_v60 = vpop.permute.xlu0 %336 }
 0x527   :  { %v339_v61 = vmul.f32 %v337_v60, %v322_v52  ;;  %v40_v60 = vld [vmem:[%s2513_s0 + $0x20] sm:$0xff] }
 0x529   :  { %v340_v62 = vpack.c.bf16 %v339_v61, %v339_v61 }
 0x52b   :  { %342 = vrot.lane.b32.xlu1 %v340_v62, %s2069_s11 }
 0x537   :  { %v58_v4 = vpop.permute.xlu0 %57 }
 0x538   :  { %v93_v9 = vmul.f32 %v2142_v6, %v58_v4 }
 0x53a   :  { %v108_v12 = vadd.f32 %v2148_v10, %v93_v9 }
 0x59d   :  { %v343_v63 = vpop.permute.xlu1 %342 }
 0x59e   :  { %1794 = vmatmul.mubr.msk.bf16.vlgmr.msra.gmra.mrb[12].mxu0 %vm145_vm4, %v343_v63 }
 0x59f   :  { %1798 = vmatpush3.bf16.msra.mxu0 %v2115_v1  ;;  %1801 = vmatprep.mubr.msk.bf16.mxu0 %vm2065_vm0, %v2064_v0 }
 0x5a0   :  { %1799 = vmatprep.subr.bf16.mxu0 %v2064_v0 }
 0x5a3   :  { %1800 = vmatpush3.bf16.msra.mxu0 %v2125_v3 }
 0x5a4   :  { %1805 = vmatprep.subr.bf16.mxu0 %v2064_v0 }
 0x5a6   :  { %1802 = vmatmul.mubr.msk.bf16.vlgmr.msra.gmra.mrb[16].mxu0 %vm145_vm4, %v343_v63 }
 0x5a7   :  { %1806 = vmatpush3.bf16.msra.mxu0 %v2163_v29  ;;  %1809 = vmatprep.mubr.msk.bf16.mxu0 %vm2065_vm0, %v2064_v0 }
 0x5a8   :  { %1807 = vmatprep.subr.bf16.mxu0 %v2064_v0 }
 0x5ab   :  { %1808 = vmatpush3.bf16.msra.mxu0 %v2169_v30 }
 0x5ac   :  { %1813 = vmatprep.subr.bf16.mxu0 %v2064_v0 }
 0x671   :  { %v2225_v5 = vpop.f32.mrb[12].mxu0 }
 0x672   :  { %v1795_v7 = vpop.f32.mrb[13].mxu0 }
 0x673   :  { %v384_v8 = vpop.f32.mrb[14].mxu0 }
 0x674   :  { %v1796_v11 = vpop.f32.mrb[15].mxu0 }
 0x679   :  { %v423_v14 = vpop.f32.mrb[16].mxu0 }
 0x67a   :  { %v429_v15 = vadd.f32 %v423_v14, %v108_v12  ;;  %v1803_v16 = vpop.f32.mrb[17].mxu0 }
 0x67b   :  { %v426_v17 = vpop.f32.mrb[18].mxu0 }
 0x67c   :  { %v430_v18 = vmul.f32 %v429_v15, %v2151_v13  ;;  %v1804_v19 = vpop.f32.mrb[19].mxu0 }
 0x67e   :  { %2008 = vtanh.f32 %v430_v18 }
 0x688   :  { %v2009_v20 = vpop.eup %2008 }
 0x689   :  { %v432_v22 = vmul.f32 %v2009_v20, %v2151_v13 }
 0x68b   :  { %v433_v23 = vadd.f32 %v432_v22, %v2154_v21 }
 0x68d   :  { %436 = vrot.lane.b32.xlu1 %v433_v23, %s2068_s1  ;;  %v434_v26 = vmul.f32 %v433_v23, %v333_v57 }
 0x6ff   :  { %v437_v24 = vpop.permute.xlu1 %436 }
 0x700   :  { %v439_v25 = vmul.f32 %v437_v24, %v433_v23 }
 0x702   :  { %441 = vrot.lane.b32.xlu0 %v439_v25, %s2069_s11 }
 0x774   :  { %v442_v27 = vpop.permute.xlu0 %441 }
 0x775   :  { %v444_v28 = vadd.f32 %v442_v27, %v434_v26 }
 0x777   :  { %2010 = vtanh.f32 %v444_v28 }
 0x781   :  { %v2011_v31 = vpop.eup %2010 }
 0x782   :  { %447 = vrot.lane.b32.xlu1 %v2011_v31, %s2068_s1 }
 0x786   :  { %62 = vperm.xlu1 %1993, %v39_v32  }
 0x7f4   :  { %v448_v33 = vpop.permute.xlu1 %447 }
 0x7f5   :  { %v450_v34 = vmul.f32 %v448_v33, %v433_v23 }
 0x7f7   :  { %v451_v35 = vpack.c.bf16 %v450_v34, %v450_v34  ;;  %v41_v34 = vld [vmem:[%s2513_s0 + $0x28] sm:$0xff] }
 0x7f9   :  { %453 = vrot.lane.b32.xlu0 %v451_v35, %s2069_s11 }
 0x805   :  { %v63_v37 = vpop.permute.xlu1 %62 }
 0x806   :  { %v94_v42 = vmul.f32 %v2142_v6, %v63_v37 }
 0x808   :  { %v109_v44 = vadd.f32 %v2148_v10, %v94_v42 }
 0x86b   :  { %v454_v36 = vpop.permute.xlu0 %453 }
 0x86c   :  { %1810 = vmatmul.mubr.msk.bf16.vlgmr.msra.gmra.mrb[20].mxu0 %vm145_vm4, %v454_v36 }
 0x86d   :  { %1814 = vmatpush3.bf16.msra.mxu0 %v2115_v1  ;;  %1817 = vmatprep.mubr.msk.bf16.mxu0 %vm2065_vm0, %v2064_v0 }
 0x86e   :  { %1815 = vmatprep.subr.bf16.mxu0 %v2064_v0 }
 0x871   :  { %1816 = vmatpush3.bf16.msra.mxu0 %v2125_v3 }
 0x872   :  { %1821 = vmatprep.subr.bf16.mxu0 %v2064_v0 }
 0x874   :  { %1818 = vmatmul.mubr.msk.bf16.vlgmr.msra.gmra.mrb[24].mxu0 %vm145_vm4, %v454_v36 }
 0x875   :  { %1822 = vmatpush3.bf16.msra.mxu0 %v2163_v29  ;;  %1825 = vmatprep.mubr.msk.bf16.mxu0 %vm2065_vm0, %v2064_v0 }
 0x876   :  { %1823 = vmatprep.subr.bf16.mxu0 %v2064_v0 }
 0x879   :  { %1824 = vmatpush3.bf16.msra.mxu0 %v2169_v30 }
 0x87a   :  { %1829 = vmatprep.subr.bf16.mxu0 %v2064_v0 }
 0x93f   :  { %v2253_v39 = vpop.f32.mrb[20].mxu0 }
 0x940   :  { %v1811_v40 = vpop.f32.mrb[21].mxu0 }
 0x941   :  { %v495_v41 = vpop.f32.mrb[22].mxu0 }
 0x942   :  { %v1812_v43 = vpop.f32.mrb[23].mxu0 }
 0x947   :  { %v534_v45 = vpop.f32.mrb[24].mxu0 }
 0x948   :  { %v540_v46 = vadd.f32 %v534_v45, %v109_v44  ;;  %v1819_v47 = vpop.f32.mrb[25].mxu0 }
 0x949   :  { %v537_v48 = vpop.f32.mrb[26].mxu0 }
 0x94a   :  { %v541_v49 = vmul.f32 %v540_v46, %v2151_v13  ;;  %v1820_v50 = vpop.f32.mrb[27].mxu0 }
 0x94c   :  { %2012 = vtanh.f32 %v541_v49 }
 0x956   :  { %v2013_v51 = vpop.eup %2012 }
 0x957   :  { %v543_v52 = vmul.f32 %v2013_v51, %v2151_v13 }
 0x959   :  { %v544_v53 = vadd.f32 %v543_v52, %v2154_v21 }
 0x95b   :  { %547 = vrot.lane.b32.xlu0 %v544_v53, %s2068_s1  ;;  %v545_v56 = vmul.f32 %v544_v53, %v444_v28 }
 0x9cd   :  { %v548_v54 = vpop.permute.xlu0 %547 }
 0x9ce   :  { %v550_v55 = vmul.f32 %v548_v54, %v544_v53 }
 0x9d0   :  { %552 = vrot.lane.b32.xlu1 %v550_v55, %s2069_s11 }
 0xa42   :  { %v553_v57 = vpop.permute.xlu1 %552 }
 0xa43   :  { %v555_v58 = vadd.f32 %v553_v57, %v545_v56 }
 0xa45   :  { %2014 = vtanh.f32 %v555_v58 }
 0xa4f   :  { %v2015_v59 = vpop.eup %2014 }
 0xa50   :  { %558 = vrot.lane.b32.xlu0 %v2015_v59, %s2068_s1  ;;  %v42_v59 = vld [vmem:[%s2513_s0 + $0x30] sm:$0xff] }
 0xa54   :  { %67 = vperm.xlu0 %1992, %v40_v60  }
 0xac2   :  { %v559_v61 = vpop.permute.xlu0 %558 }
 0xac3   :  { %v561_v62 = vmul.f32 %v559_v61, %v544_v53 }
 0xac5   :  { %v562_v63 = vpack.c.bf16 %v561_v62, %v561_v62 }
 0xac7   :  { %564 = vrot.lane.b32.xlu1 %v562_v63, %s2069_s11 }
 0xad3   :  { %v68_v7 = vpop.permute.xlu0 %67 }
 0xad4   :  { %v95_v12 = vmul.f32 %v2142_v6, %v68_v7 }
 0xad6   :  { %v110_v15 = vadd.f32 %v2148_v10, %v95_v12 }
 0xb39   :  { %v565_v4 = vpop.permute.xlu1 %564 }
 0xb3a   :  { %1826 = vmatmul.mubr.msk.bf16.vlgmr.msra.gmra.mrb[28].mxu0 %vm145_vm4, %v565_v4 }
 0xb3b   :  { %1830 = vmatpush3.bf16.msra.mxu0 %v2115_v1  ;;  %1833 = vmatprep.mubr.msk.bf16.mxu0 %vm2065_vm0, %v2064_v0 }
 0xb3c   :  { %1831 = vmatprep.subr.bf16.mxu0 %v2064_v0 }
 0xb3f   :  { %1832 = vmatpush3.bf16.msra.mxu0 %v2125_v3 }
 0xb40   :  { %1845 = vmatprep.subr.bf16.mxu0 %v2064_v0 }
 0xb42   :  { %1834 = vmatmul.mubr.msk.bf16.vlgmr.msra.gmra.mrb[32].mxu0 %vm145_vm4, %v565_v4 }
 0xb43   :  { %1846 = vmatpush3.bf16.msra.mxu0 %v2115_v1  ;;  %1849 = vmatprep.mubr.msk.bf16.mxu0 %vm2065_vm0, %v2064_v0 }
 0xb44   :  { %1847 = vmatprep.subr.bf16.mxu0 %v2064_v0 }
 0xb47   :  { %1848 = vmatpush3.bf16.msra.mxu0 %v2125_v3 }
 0xb48   :  { %1861 = vmatprep.subr.bf16.mxu0 %v2064_v0 }
 0xc0d   :  { %v2281_v8 = vpop.f32.mrb[28].mxu0 }
 0xc0e   :  { %v1827_v9 = vpop.f32.mrb[29].mxu0 }
 0xc0f   :  { %v606_v11 = vpop.f32.mrb[30].mxu0 }
 0xc10   :  { %v1828_v14 = vpop.f32.mrb[31].mxu0 }
 0xc15   :  { %v645_v16 = vpop.f32.mrb[32].mxu0 }
 0xc16   :  { %v651_v17 = vadd.f32 %v645_v16, %v110_v15  ;;  %v1835_v18 = vpop.f32.mrb[33].mxu0 }
 0xc17   :  { %v648_v19 = vpop.f32.mrb[34].mxu0 }
 0xc18   :  { %v652_v20 = vmul.f32 %v651_v17, %v2151_v13  ;;  %v1836_v22 = vpop.f32.mrb[35].mxu0 }
 0xc1a   :  { %2016 = vtanh.f32 %v652_v20 }
 0xc24   :  { %v2017_v23 = vpop.eup %2016 }
 0xc25   :  { %v654_v24 = vmul.f32 %v2017_v23, %v2151_v13 }
 0xc27   :  { %v655_v25 = vadd.f32 %v654_v24, %v2154_v21 }
 0xc29   :  { %658 = vrot.lane.b32.xlu1 %v655_v25, %s2068_s1  ;;  %v656_v28 = vmul.f32 %v655_v25, %v555_v58 }
 0xc9b   :  { %v659_v26 = vpop.permute.xlu1 %658 }
 0xc9c   :  { %v661_v27 = vmul.f32 %v659_v26, %v655_v25  ;;  %v43_v26 = vld [vmem:[%s2513_s0 + $0x38] sm:$0xff] }
 0xc9e   :  { %663 = vrot.lane.b32.xlu0 %v661_v27, %s2069_s11 }
 0xd10   :  { %v664_v31 = vpop.permute.xlu0 %663 }
 0xd11   :  { %v666_v32 = vadd.f32 %v664_v31, %v656_v28 }
 0xd13   :  { %2018 = vtanh.f32 %v666_v32 }
 0xd1d   :  { %v2019_v33 = vpop.eup %2018 }
 0xd1e   :  { %669 = vrot.lane.b32.xlu1 %v2019_v33, %s2068_s1 }
 0xd22   :  { %72 = vperm.xlu1 %1993, %v41_v34  }
 0xd90   :  { %v670_v35 = vpop.permute.xlu1 %669 }
 0xd91   :  { %v672_v36 = vmul.f32 %v670_v35, %v655_v25 }
 0xd93   :  { %v673_v37 = vpack.c.bf16 %v672_v36, %v672_v36 }
 0xd95   :  { %675 = vrot.lane.b32.xlu0 %v673_v37, %s2069_s11 }
 0xda1   :  { %v73_v41 = vpop.permute.xlu1 %72 }
 0xda2   :  { %v96_v42 = vmul.f32 %v2142_v6, %v73_v41 }
 0xda4   :  { %v111_v43 = vadd.f32 %v2148_v10, %v96_v42 }
 0xe07   :  { %v676_v40 = vpop.permute.xlu0 %675 }
 0xe08   :  { %1842 = vmatmul.mubr.msk.bf16.vlgmr.msra.gmra.mrb[0].mxu1 %vm145_vm4, %v676_v40  ;;  %1850 = vmatmul.mubr.msk.bf16.vlgmr.msra.gmra.mrb[36].mxu0 %vm145_vm4, %v676_v40 }
 0xe09   :  { %1862 = vmatpush3.bf16.msra.mxu0 %v2115_v1  ;;  %1854 = vmatpush3.bf16.msra.mxu1 %v2163_v29 }
 0xe0a   :  { %1863 = vmatprep.subr.bf16.mxu0 %v2064_v0  ;;  %1855 = vmatprep.subr.bf16.mxu1 %v2064_v0 }
 0xe0b   :  { %1857 = vmatprep.mubr.msk.bf16.mxu1 %vm2065_vm0, %v2064_v0  ;;  %1865 = vmatprep.mubr.msk.bf16.mxu0 %vm2065_vm0, %v2064_v0 }
 0xe0d   :  { %1864 = vmatpush3.bf16.msra.mxu0 %v2125_v3  ;;  %1856 = vmatpush3.bf16.msra.mxu1 %v2169_v30 }
 0xe0e   :  { %1877 = vmatprep.subr.bf16.mxu0 %v2064_v0  ;;  %1869 = vmatprep.subr.bf16.mxu1 %v2064_v0 }
 0xedb   :  { %v756_v44 = vpop.f32.mrb[36].mxu0 }
 0xedc   :  { %v762_v45 = vadd.f32 %v756_v44, %v111_v43  ;;  %v1851_v46 = vpop.f32.mrb[37].mxu0 }
 0xedd   :  { %v759_v47 = vpop.f32.mrb[38].mxu0 }
 0xede   :  { %v763_v48 = vmul.f32 %v762_v45, %v2151_v13  ;;  %v1852_v49 = vpop.f32.mrb[39].mxu0 }
 0xee0   :  { %2020 = vtanh.f32 %v763_v48 }
 0xeea   :  { %v2021_v50 = vpop.eup %2020 }
 0xeeb   :  { %v765_v51 = vmul.f32 %v2021_v50, %v2151_v13 }
 0xeed   :  { %v766_v52 = vadd.f32 %v765_v51, %v2154_v21 }
 0xeef   :  { %769 = vrot.lane.b32.xlu0 %v766_v52, %s2068_s1  ;;  %v767_v55 = vmul.f32 %v766_v52, %v666_v32 }
 0xf61   :  { %v770_v53 = vpop.permute.xlu0 %769 }
 0xf62   :  { %v772_v54 = vmul.f32 %v770_v53, %v766_v52 }
 0xf64   :  { %774 = vrot.lane.b32.xlu1 %v772_v54, %s2069_s11  ;;  %v2373_v54 = vld [vmem:[%s2512_s3 + $0x18] sm:$0xff]  }
 0xfd6   :  { %v775_v56 = vpop.permute.xlu1 %774 }
 0xfd7   :  { %v777_v57 = vadd.f32 %v775_v56, %v767_v55  ;;  %v2390_v55 = vld [vmem:[%s2515_s4 + $0x1] ss:$0 sm:$0xff] }
 0xfd8   :  { %v271_v56 = vadd.f32 %v2390_v55, %v2197_v38 }
 0xfd9   :  { %2022 = vtanh.f32 %v777_v57 }
 0xfe3   :  { %v2023_v58 = vpop.eup %2022 }
 0xfe4   :  { %780 = vrot.lane.b32.xlu0 %v2023_v58, %s2068_s1 }
 0xfe8   :  { %77 = vperm.xlu0 %1992, %v42_v59  }
0x1056   :  { %v781_v60 = vpop.permute.xlu0 %780 }
0x1057   :  { %v783_v61 = vmul.f32 %v781_v60, %v766_v52  ;;  %v2366_v52 = vld [vmem:[%s2512_s3 + $0x10] sm:$0xff]  }
0x1059   :  { %v784_v62 = vpack.c.bf16 %v783_v61, %v783_v61 }
0x105b   :  { %786 = vrot.lane.b32.xlu1 %v784_v62, %s2069_s11 }
0x1067   :  { %v78_v4 = vpop.permute.xlu0 %77 }
0x10cd   :  { %v787_v63 = vpop.permute.xlu1 %786 }
0x10ce   :  { %1858 = vmatmul.mubr.msk.bf16.vlgmr.msra.gmra.mrb[4].mxu1 %vm145_vm4, %v787_v63  ;;  %1866 = vmatmul.mubr.msk.bf16.vlgmr.msra.gmra.mrb[40].mxu0 %vm145_vm4, %v787_v63 }
0x10cf   :  { %1878 = vmatpush3.bf16.msra.mxu0 %v2115_v1  ;;  %1870 = vmatpush3.bf16.msra.mxu1 %v2163_v29  ;;  %v97_v1 = vmul.f32 %v2142_v6, %v78_v4 }
0x10d0   :  { %1879 = vmatprep.subr.bf16.mxu0 %v2064_v0  ;;  %1871 = vmatprep.subr.bf16.mxu1 %v2064_v0 }
0x10d1   :  { %1873 = vmatprep.mubr.msk.bf16.mxu1 %vm2065_vm0, %v2064_v0  ;;  %1881 = vmatprep.mubr.msk.bf16.mxu0 %vm2065_vm0, %v2064_v0  ;;  %v112_v7 = vadd.f32 %v2148_v10, %v97_v1 }
0x10d3   :  { %1880 = vmatpush3.bf16.msra.mxu0 %v2125_v3  ;;  %1872 = vmatpush3.bf16.msra.mxu1 %v2169_v30 }
0x10d4   :  { %1885 = vmatprep.subr.bf16.mxu1 %v2064_v0 }
0x11a1   :  { %v867_v9 = vpop.f32.mrb[40].mxu0 }
0x11a2   :  { %v873_v11 = vadd.f32 %v867_v9, %v112_v7  ;;  %v1867_v12 = vpop.f32.mrb[41].mxu0 }
0x11a3   :  { %v870_v14 = vpop.f32.mrb[42].mxu0 }
0x11a4   :  { %v874_v15 = vmul.f32 %v873_v11, %v2151_v13  ;;  %v1868_v16 = vpop.f32.mrb[43].mxu0 }
0x11a6   :  { %2024 = vtanh.f32 %v874_v15 }
0x11b0   :  { %v2025_v17 = vpop.eup %2024 }
0x11b1   :  { %v876_v3 = vmul.f32 %v2025_v17, %v2151_v13 }
0x11b3   :  { %v877_v18 = vadd.f32 %v876_v3, %v2154_v21  ;;  %v382_v3 = vadd.f32 %v2390_v55, %v2225_v5 }
0x11b5   :  { %880 = vrot.lane.b32.xlu1 %v877_v18, %s2068_s1  ;;  %v878_v22 = vmul.f32 %v877_v18, %v777_v57 }
0x1227   :  { %v881_v19 = vpop.permute.xlu1 %880 }
0x1228   :  { %v883_v20 = vmul.f32 %v881_v19, %v877_v18 }
0x122a   :  { %885 = vrot.lane.b32.xlu0 %v883_v20, %s2069_s11 }
0x129c   :  { %v886_v23 = vpop.permute.xlu0 %885 }
0x129d   :  { %v888_v24 = vadd.f32 %v886_v23, %v878_v22 }
0x129f   :  { %2026 = vtanh.f32 %v888_v24 }
0x12a9   :  { %v2027_v25 = vpop.eup %2026 }
0x12aa   :  { %891 = vrot.lane.b32.xlu1 %v2027_v25, %s2068_s1 }
0x12ae   :  { %82 = vperm.xlu1 %1993, %v43_v26  }
0x131c   :  { %v892_v27 = vpop.permute.xlu1 %891 }
0x131d   :  { %v894_v28 = vmul.f32 %v892_v27, %v877_v18 }
0x131f   :  { %v895_v31 = vpack.c.bf16 %v894_v28, %v894_v28 }
0x1321   :  { %897 = vrot.lane.b32.xlu0 %v895_v31, %s2069_s11 }
0x132d   :  { %v83_v33 = vpop.permute.xlu1 %82 }
0x132e   :  { %v98_v34 = vmul.f32 %v2142_v6, %v83_v33 }
0x1330   :  { %v113_v35 = vadd.f32 %v2148_v10, %v98_v34 }
0x1393   :  { %v898_v32 = vpop.permute.xlu0 %897 }
0x1394   :  { %1874 = vmatmul.mubr.msk.bf16.vlgmr.msra.gmra.mrb[8].mxu1 %vm145_vm4, %v898_v32  ;;  %1882 = vmatmul.mubr.msk.bf16.vlgmr.msra.gmra.mrb[44].mxu0 %vm145_vm4, %v898_v32 }
0x1395   :  { %1886 = vmatpush3.bf16.msra.mxu1 %v2163_v29  ;;  %1889 = vmatprep.mubr.msk.bf16.mxu1 %vm2065_vm0, %v2064_v0 }
0x1396   :  { %1887 = vmatprep.subr.bf16.mxu1 %v2064_v0 }
0x1399   :  { %1888 = vmatpush3.bf16.msra.mxu1 %v2169_v30 }
0x139a   :  { %1893 = vmatprep.subr.bf16.mxu1 %v2064_v0 }
0x1467   :  { %v978_v36 = vpop.f32.mrb[44].mxu0 }
0x1468   :  { %v984_v37 = vadd.f32 %v978_v36, %v113_v35  ;;  %v1883_v40 = vpop.f32.mrb[45].mxu0 }
0x1469   :  { %v981_v41 = vpop.f32.mrb[46].mxu0 }
0x146a   :  { %v985_v29 = vmul.f32 %v984_v37, %v2151_v13  ;;  %v1884_v42 = vpop.f32.mrb[47].mxu0  ;;  %v493_v41 = vadd.f32 %v2390_v55, %v2253_v39 }
0x146c   :  { %2028 = vtanh.f32 %v985_v29 }
0x1476   :  { %v2029_v43 = vpop.eup %2028 }
0x1477   :  { %v987_v44 = vmul.f32 %v2029_v43, %v2151_v13 }
0x1479   :  { %v988_v30 = vadd.f32 %v987_v44, %v2154_v21 }
0x147b   :  { %991 = vrot.lane.b32.xlu0 %v988_v30, %s2068_s1  ;;  %v989_v6 = vmul.f32 %v988_v30, %v888_v24 }
0x14ed   :  { %v992_v45 = vpop.permute.xlu0 %991 }
0x14ee   :  { %v994_v46 = vmul.f32 %v992_v45, %v988_v30 }
0x14f0   :  { %996 = vrot.lane.b32.xlu1 %v994_v46, %s2069_s11 }
0x1562   :  { %v997_v10 = vpop.permute.xlu1 %996 }
0x1563   :  { %v999_v47 = vadd.f32 %v997_v10, %v989_v6 }
0x1565   :  { %2030 = vtanh.f32 %v999_v47 }
0x156f   :  { %v2031_v48 = vpop.eup %2030 }
0x1570   :  { %1002 = vrot.lane.b32.xlu0 %v2031_v48, %s2068_s1 }
0x15e2   :  { %v1003_v49 = vpop.permute.xlu0 %1002 }
0x15e3   :  { %v1005_v50 = vmul.f32 %v1003_v49, %v988_v30 }
0x15e5   :  { %v1006_v51 = vpack.c.bf16 %v1005_v50, %v1005_v50 }
0x15e7   :  { %1008 = vrot.lane.b32.xlu1 %v1006_v51, %s2069_s11 }
0x1659   :  { %v1009_v53 = vpop.permute.xlu1 %1008 }
0x165a   :  { %1890 = vmatmul.mubr.msk.bf16.vlgmr.msra.gmra.mrb[12].mxu1 %vm145_vm4, %v1009_v53 }
0x165b   :  { %1894 = vmatpush3.bf16.msra.mxu1 %v2366_v52  ;;  %1897 = vmatprep.mubr.msk.bf16.mxu1 %vm2065_vm0, %v2064_v0 }
0x165c   :  { %1895 = vmatprep.subr.bf16.mxu1 %v2064_v0 }
0x165f   :  { %1896 = vmatpush3.bf16.msra.mxu1 %v2373_v54 }
0x1660   :  { %1901 = vmatprep.subr.bf16.mxu1 %v2064_v0 }
0x1662   :  { %1898 = vmatmul.mubr.bf16.vlgmr.msra.gmra.mrb[16].mxu1 %v2066_v2 }
0x1663   :  { %1902 = vmatpush3.bf16.msra.mxu1 %v2366_v52  ;;  %1905 = vmatprep.mubr.msk.bf16.mxu1 %vm2065_vm0, %v2064_v0 }
0x1664   :  { %1903 = vmatprep.subr.bf16.mxu1 %v2064_v0 }
0x1667   :  { %1904 = vmatpush3.bf16.msra.mxu1 %v2373_v54 }
0x1668   :  { %1909 = vmatprep.subr.bf16.mxu1 %v2064_v0 }
0x1735   :  { %v1106_v2 = vpop.f32.mrb[16].mxu1 }
0x1736   :  { %v1112_v57 = vadd.f32 %v1106_v2, %v271_v56  ;;  %v1899_v58 = vpop.f32.mrb[17].mxu1 }
0x1737   :  { %v1109_v59 = vpop.f32.mrb[18].mxu1  ;;  %v604_v58 = vadd.f32 %v2390_v55, %v2281_v8 }
0x1738   :  { %v1113_v60 = vmul.f32 %v1112_v57, %v2151_v13  ;;  %v1900_v61 = vpop.f32.mrb[19].mxu1 }
0x173a   :  { %2032 = vtanh.f32 %v1113_v60 }
0x1744   :  { %v2033_v62 = vpop.eup %2032 }
0x1745   :  { %v1115_v63 = vmul.f32 %v2033_v62, %v2151_v13 }
0x1747   :  { %v1116_v4 = vadd.f32 %v1115_v63, %v2154_v21 }
0x1749   :  { %1119 = vrot.lane.b32.xlu0 %v1116_v4, %s2068_s1  ;;  %v1117_v38 = vmul.f32 0.0, %v1116_v4 }
0x17bb   :  { %v1120_v1 = vpop.permute.xlu0 %1119 }
0x17bc   :  { %v1122_v7 = vmul.f32 %v1120_v1, %v1116_v4 }
0x17be   :  { %1124 = vrot.lane.b32.xlu1 %v1122_v7, %s2069_s11 }
0x1830   :  { %v1125_v9 = vpop.permute.xlu1 %1124 }
0x1831   :  { %v1127_v11 = vadd.f32 %v1125_v9, %v1117_v38 }
0x1833   :  { %2034 = vtanh.f32 %v1127_v11 }
0x183d   :  { %v2035_v12 = vpop.eup %2034 }
0x183e   :  { %1130 = vrot.lane.b32.xlu0 %v2035_v12, %s2068_s1 }
0x18b0   :  { %v1131_v14 = vpop.permute.xlu0 %1130 }
0x18b1   :  { %v1133_v15 = vmul.f32 %v1131_v14, %v1116_v4 }
0x18b3   :  { %v1135_v16 = vpack.c.bf16 %v1133_v15, %v1133_v15 }
0x18b5   :  { %1137 = vrot.lane.b32.xlu1 %v1135_v16, %s2069_s11 }
0x1927   :  { %v1138_v17 = vpop.permute.xlu1 %1137 }
0x1928   :  { %1906 = vmatmul.mubr.msk.bf16.vlgmr.msra.gmra.mrb[20].mxu1 %vm145_vm4, %v1138_v17 }
0x1929   :  { %1910 = vmatpush3.bf16.msra.mxu1 %v2366_v52  ;;  %1913 = vmatprep.mubr.msk.bf16.mxu1 %vm2065_vm0, %v2064_v0 }
0x192a   :  { %1911 = vmatprep.subr.bf16.mxu1 %v2064_v0 }
0x192d   :  { %1912 = vmatpush3.bf16.msra.mxu1 %v2373_v54 }
0x192e   :  { %1917 = vmatprep.subr.bf16.mxu1 %v2064_v0 }
0x19fb   :  { %v1176_v18 = vpop.f32.mrb[20].mxu1 }
0x19fc   :  { %v1182_v19 = vadd.f32 %v1176_v18, %v382_v3  ;;  %v1907_v20 = vpop.f32.mrb[21].mxu1 }
0x19fd   :  { %v1179_v22 = vpop.f32.mrb[22].mxu1 }
0x19fe   :  { %v1183_v23 = vmul.f32 %v1182_v19, %v2151_v13  ;;  %v1908_v24 = vpop.f32.mrb[23].mxu1 }
0x1a00   :  { %2036 = vtanh.f32 %v1183_v23 }
0x1a0a   :  { %v2037_v25 = vpop.eup %2036 }
0x1a0b   :  { %v1185_v26 = vmul.f32 %v2037_v25, %v2151_v13 }
0x1a0d   :  { %v1186_v27 = vadd.f32 %v1185_v26, %v2154_v21 }
0x1a0f   :  { %1189 = vrot.lane.b32.xlu0 %v1186_v27, %s2068_s1  ;;  %v1187_v5 = vmul.f32 %v1186_v27, %v1127_v11 }
0x1a81   :  { %v1190_v28 = vpop.permute.xlu0 %1189 }
0x1a82   :  { %v1192_v31 = vmul.f32 %v1190_v28, %v1186_v27 }
0x1a84   :  { %1194 = vrot.lane.b32.xlu1 %v1192_v31, %s2069_s11 }
0x1af6   :  { %v1195_v32 = vpop.permute.xlu1 %1194 }
0x1af7   :  { %v1197_v33 = vadd.f32 %v1195_v32, %v1187_v5 }
0x1af9   :  { %2038 = vtanh.f32 %v1197_v33 }
0x1b03   :  { %v2039_v34 = vpop.eup %2038 }
0x1b04   :  { %1200 = vrot.lane.b32.xlu0 %v2039_v34, %s2068_s1 }
0x1b76   :  { %v1201_v35 = vpop.permute.xlu0 %1200 }
0x1b77   :  { %v1203_v36 = vmul.f32 %v1201_v35, %v1186_v27 }
0x1b79   :  { %v1205_v37 = vpack.c.bf16 %v1203_v36, %v1203_v36 }
0x1b7b   :  { %1207 = vrot.lane.b32.xlu1 %v1205_v37, %s2069_s11 }
0x1bed   :  { %v1208_v40 = vpop.permute.xlu1 %1207 }
0x1bee   :  { %1914 = vmatmul.mubr.msk.bf16.vlgmr.msra.gmra.mrb[24].mxu1 %vm145_vm4, %v1208_v40 }
0x1bef   :  { %1918 = vmatpush3.bf16.msra.mxu1 %v2366_v52  ;;  %1921 = vmatprep.mubr.msk.bf16.mxu1 %vm2065_vm0, %v2064_v0 }
0x1bf0   :  { %1919 = vmatprep.subr.bf16.mxu1 %v2064_v0 }
0x1bf3   :  { %1920 = vmatpush3.bf16.msra.mxu1 %v2373_v54 }
0x1bf4   :  { %1925 = vmatprep.subr.bf16.mxu1 %v2064_v0 }
0x1cc1   :  { %v1246_v29 = vpop.f32.mrb[24].mxu1 }
0x1cc2   :  { %v1252_v42 = vadd.f32 %v1246_v29, %v493_v41  ;;  %v1915_v43 = vpop.f32.mrb[25].mxu1 }
0x1cc3   :  { %v1249_v44 = vpop.f32.mrb[26].mxu1 }
0x1cc4   :  { %v1253_v30 = vmul.f32 %v1252_v42, %v2151_v13  ;;  %v1916_v45 = vpop.f32.mrb[27].mxu1 }
0x1cc6   :  { %2040 = vtanh.f32 %v1253_v30 }
0x1cd0   :  { %v2041_v46 = vpop.eup %2040 }
0x1cd1   :  { %v1255_v6 = vmul.f32 %v2041_v46, %v2151_v13 }
0x1cd3   :  { %v1256_v10 = vadd.f32 %v1255_v6, %v2154_v21 }
0x1cd5   :  { %1259 = vrot.lane.b32.xlu0 %v1256_v10, %s2068_s1  ;;  %v1257_v39 = vmul.f32 %v1256_v10, %v1197_v33 }
0x1d47   :  { %v1260_v47 = vpop.permute.xlu0 %1259 }
0x1d48   :  { %v1262_v48 = vmul.f32 %v1260_v47, %v1256_v10 }
0x1d4a   :  { %1264 = vrot.lane.b32.xlu1 %v1262_v48, %s2069_s11 }
0x1dbc   :  { %v1265_v49 = vpop.permute.xlu1 %1264 }
0x1dbd   :  { %v1267_v50 = vadd.f32 %v1265_v49, %v1257_v39 }
0x1dbf   :  { %2042 = vtanh.f32 %v1267_v50 }
0x1dc9   :  { %v2043_v51 = vpop.eup %2042 }
0x1dca   :  { %1270 = vrot.lane.b32.xlu0 %v2043_v51, %s2068_s1 }
0x1e3c   :  { %v1271_v53 = vpop.permute.xlu0 %1270 }
0x1e3d   :  { %v1273_v56 = vmul.f32 %v1271_v53, %v1256_v10 }
0x1e3f   :  { %v1275_v2 = vpack.c.bf16 %v1273_v56, %v1273_v56 }
0x1e41   :  { %1277 = vrot.lane.b32.xlu1 %v1275_v2, %s2069_s11 }
0x1eb3   :  { %v1278_v57 = vpop.permute.xlu1 %1277 }
0x1eb4   :  { %1922 = vmatmul.mubr.msk.bf16.vlgmr.msra.gmra.mrb[28].mxu1 %vm145_vm4, %v1278_v57 }
0x1eb5   :  { %1926 = vmatpush3.bf16.msra.mxu1 %v2366_v52  ;;  %1929 = vmatprep.mubr.msk.bf16.mxu1 %vm2065_vm0, %v2064_v0 }
0x1eb6   :  { %1927 = vmatprep.subr.bf16.mxu1 %v2064_v0 }
0x1eb9   :  { %1928 = vmatpush3.bf16.msra.mxu1 %v2373_v54 }
0x1eba   :  { %1933 = vmatprep.subr.bf16.mxu1 %v2064_v0 }
0x1f87   :  { %v1316_v59 = vpop.f32.mrb[28].mxu1 }
0x1f88   :  { %v1322_v60 = vadd.f32 %v1316_v59, %v604_v58  ;;  %v1923_v61 = vpop.f32.mrb[29].mxu1 }
0x1f89   :  { %v1319_v62 = vpop.f32.mrb[30].mxu1 }
0x1f8a   :  { %v1323_v63 = vmul.f32 %v1322_v60, %v2151_v13  ;;  %v1924_v4 = vpop.f32.mrb[31].mxu1 }
0x1f8c   :  { %2044 = vtanh.f32 %v1323_v63 }
0x1f96   :  { %v2045_v1 = vpop.eup %2044 }
0x1f97   :  { %v1325_v7 = vmul.f32 %v2045_v1, %v2151_v13 }
0x1f99   :  { %v1326_v38 = vadd.f32 %v1325_v7, %v2154_v21 }
0x1f9b   :  { %1329 = vrot.lane.b32.xlu0 %v1326_v38, %s2068_s1  ;;  %v1327_v8 = vmul.f32 %v1326_v38, %v1267_v50 }
0x200d   :  { %v1330_v9 = vpop.permute.xlu0 %1329 }
0x200e   :  { %v1332_v11 = vmul.f32 %v1330_v9, %v1326_v38 }
0x2010   :  { %1334 = vrot.lane.b32.xlu1 %v1332_v11, %s2069_s11 }
0x2082   :  { %v1335_v12 = vpop.permute.xlu1 %1334 }
0x2083   :  { %v1337_v14 = vadd.f32 %v1335_v12, %v1327_v8 }
0x2085   :  { %2046 = vtanh.f32 %v1337_v14 }
0x208f   :  { %v2047_v15 = vpop.eup %2046 }
0x2090   :  { %1340 = vrot.lane.b32.xlu0 %v2047_v15, %s2068_s1 }
0x2102   :  { %v1341_v16 = vpop.permute.xlu0 %1340 }
0x2103   :  { %v1343_v17 = vmul.f32 %v1341_v16, %v1326_v38 }
0x2105   :  { %v1345_v3 = vpack.c.bf16 %v1343_v17, %v1343_v17 }
0x2107   :  { %1347 = vrot.lane.b32.xlu1 %v1345_v3, %s2069_s11 }
0x2179   :  { %v1348_v18 = vpop.permute.xlu1 %1347 }
0x217a   :  { %1930 = vmatmul.mubr.msk.bf16.vlgmr.msra.gmra.mrb[0].mxu1 %vm145_vm4, %v1348_v18 }
0x217b   :  { %1934 = vmatpush3.bf16.msra.mxu1 %v2366_v52  ;;  %1937 = vmatprep.mubr.msk.bf16.mxu1 %vm2065_vm0, %v2064_v0 }
0x217c   :  { %1935 = vmatprep.subr.bf16.mxu1 %v2064_v0 }
0x217f   :  { %1936 = vmatpush3.bf16.msra.mxu1 %v2373_v54 }
0x2180   :  { %1941 = vmatprep.subr.bf16.mxu1 %v2064_v0 }
0x224d   :  { %v1386_v19 = vpop.f32.mrb[0].mxu1 }
0x224e   :  { %v1965_v20 = vadd.f32 %v2390_v55, %v1386_v19  ;;  %v1931_v22 = vpop.f32.mrb[1].mxu1 }
0x224f   :  { %v1389_v23 = vpop.f32.mrb[2].mxu1 }
0x2250   :  { %v1393_v24 = vmul.f32 %v1965_v20, %v2151_v13  ;;  %v1932_v25 = vpop.f32.mrb[3].mxu1 }
0x2252   :  { %2048 = vtanh.f32 %v1393_v24 }
0x225c   :  { %v2049_v26 = vpop.eup %2048 }
0x225d   :  { %v1395_v27 = vmul.f32 %v2049_v26, %v2151_v13 }
0x225f   :  { %v1396_v28 = vadd.f32 %v1395_v27, %v2154_v21 }
0x2261   :  { %1399 = vrot.lane.b32.xlu0 %v1396_v28, %s2068_s1  ;;  %v1397_v32 = vmul.f32 %v1396_v28, %v1337_v14 }
0x22d3   :  { %v1400_v31 = vpop.permute.xlu0 %1399 }
0x22d4   :  { %v1402_v5 = vmul.f32 %v1400_v31, %v1396_v28 }
0x22d6   :  { %1404 = vrot.lane.b32.xlu1 %v1402_v5, %s2069_s11 }
0x2348   :  { %v1405_v33 = vpop.permute.xlu1 %1404 }
0x2349   :  { %v1407_v34 = vadd.f32 %v1405_v33, %v1397_v32 }
0x234b   :  { %2050 = vtanh.f32 %v1407_v34 }
0x2355   :  { %v2051_v35 = vpop.eup %2050 }
0x2356   :  { %1410 = vrot.lane.b32.xlu0 %v2051_v35, %s2068_s1 }
0x23c8   :  { %v1411_v36 = vpop.permute.xlu0 %1410 }
0x23c9   :  { %v1413_v37 = vmul.f32 %v1411_v36, %v1396_v28 }
0x23cb   :  { %v1415_v40 = vpack.c.bf16 %v1413_v37, %v1413_v37 }
0x23cd   :  { %1417 = vrot.lane.b32.xlu1 %v1415_v40, %s2069_s11 }
0x243f   :  { %v1418_v41 = vpop.permute.xlu1 %1417 }
0x2440   :  { %1938 = vmatmul.mubr.msk.bf16.vlgmr.msra.gmra.mrb[4].mxu1 %vm145_vm4, %v1418_v41 }
0x2441   :  { %1942 = vmatpush3.bf16.msra.mxu1 %v2366_v52  ;;  %1945 = vmatprep.mubr.msk.bf16.mxu1 %vm2065_vm0, %v2064_v0 }
0x2442   :  { %1943 = vmatprep.subr.bf16.mxu1 %v2064_v0 }
0x2445   :  { %1944 = vmatpush3.bf16.msra.mxu1 %v2373_v54 }
0x2446   :  { %1949 = vmatprep.subr.bf16.mxu1 %v2064_v0 }
0x2513   :  { %v1456_v29 = vpop.f32.mrb[4].mxu1 }
0x2514   :  { %v1966_v42 = vadd.f32 %v2390_v55, %v1456_v29  ;;  %v1939_v43 = vpop.f32.mrb[5].mxu1 }
0x2515   :  { %v1459_v44 = vpop.f32.mrb[6].mxu1 }
0x2516   :  { %v1463_v30 = vmul.f32 %v1966_v42, %v2151_v13  ;;  %v1940_v45 = vpop.f32.mrb[7].mxu1 }
0x2518   :  { %2052 = vtanh.f32 %v1463_v30 }
0x2522   :  { %v2053_v46 = vpop.eup %2052 }
0x2523   :  { %v1465_v6 = vmul.f32 %v2053_v46, %v2151_v13 }
0x2525   :  { %v1466_v10 = vadd.f32 %v1465_v6, %v2154_v21 }
0x2527   :  { %1469 = vrot.lane.b32.xlu0 %v1466_v10, %s2068_s1  ;;  %v1467_v39 = vmul.f32 %v1466_v10, %v1407_v34 }
0x2599   :  { %v1470_v47 = vpop.permute.xlu0 %1469 }
0x259a   :  { %v1472_v48 = vmul.f32 %v1470_v47, %v1466_v10 }
0x259c   :  { %1474 = vrot.lane.b32.xlu1 %v1472_v48, %s2069_s11 }
0x260e   :  { %v1475_v49 = vpop.permute.xlu1 %1474 }
0x260f   :  { %v1477_v50 = vadd.f32 %v1475_v49, %v1467_v39 }
0x2611   :  { %2054 = vtanh.f32 %v1477_v50 }
0x261b   :  { %v2055_v51 = vpop.eup %2054 }
0x261c   :  { %1480 = vrot.lane.b32.xlu0 %v2055_v51, %s2068_s1 }
0x268e   :  { %v1481_v53 = vpop.permute.xlu0 %1480 }
0x268f   :  { %v1483_v56 = vmul.f32 %v1481_v53, %v1466_v10 }
0x2691   :  { %v1485_v2 = vpack.c.bf16 %v1483_v56, %v1483_v56 }
0x2693   :  { %1487 = vrot.lane.b32.xlu1 %v1485_v2, %s2069_s11 }
0x2705   :  { %v1488_v57 = vpop.permute.xlu1 %1487 }
0x2706   :  { %1946 = vmatmul.mubr.msk.bf16.vlgmr.msra.gmra.mrb[8].mxu1 %vm145_vm4, %v1488_v57 }
0x2707   :  { %1950 = vmatpush3.bf16.msra.mxu1 %v2366_v52  ;;  %1953 = vmatprep.mubr.msk.bf16.mxu1 %vm2065_vm0, %v2064_v0 }
0x2708   :  { %1951 = vmatprep.subr.bf16.mxu1 %v2064_v0 }
0x270b   :  { %1952 = vmatpush3.bf16.msra.mxu1 %v2373_v54 }
0x27d9   :  { %v1526_v58 = vpop.f32.mrb[8].mxu1 }
0x27da   :  { %v1967_v59 = vadd.f32 %v2390_v55, %v1526_v58  ;;  %v1947_v60 = vpop.f32.mrb[9].mxu1 }
0x27db   :  { %v1529_v61 = vpop.f32.mrb[10].mxu1 }
0x27dc   :  { %v1533_v62 = vmul.f32 %v1967_v59, %v2151_v13  ;;  %v1948_v63 = vpop.f32.mrb[11].mxu1 }
0x27de   :  { %2056 = vtanh.f32 %v1533_v62 }
0x27e8   :  { %v2057_v4 = vpop.eup %2056 }
0x27e9   :  { %v1535_v1 = vmul.f32 %v2057_v4, %v2151_v13 }
0x27eb   :  { %v1536_v52 = vadd.f32 %v1535_v1, %v2154_v21 }
0x27ed   :  { %1539 = vrot.lane.b32.xlu0 %v1536_v52, %s2068_s1  ;;  %v1537_v54 = vmul.f32 %v1536_v52, %v1477_v50 }
0x285f   :  { %v1540_v7 = vpop.permute.xlu0 %1539 }
0x2860   :  { %v1542_v0 = vmul.f32 %v1540_v7, %v1536_v52 }
0x2862   :  { %1544 = vrot.lane.b32.xlu1 %v1542_v0, %s2069_s11 }
0x28d4   :  { %v1545_v38 = vpop.permute.xlu1 %1544 }
0x28d5   :  { %v1547_v9 = vadd.f32 %v1545_v38, %v1537_v54 }
0x28d7   :  { %2058 = vtanh.f32 %v1547_v9 }
0x28e1   :  { %v2059_v11 = vpop.eup %2058 }
0x28e2   :  { %1550 = vrot.lane.b32.xlu0 %v2059_v11, %s2068_s1 }
0x2954   :  { %v1551_v8 = vpop.permute.xlu0 %1550 }
0x2955   :  { %v1553_v12 = vmul.f32 %v1551_v8, %v1536_v52 }
0x2957   :  { %v1555_v14 = vpack.c.bf16 %v1553_v12, %v1553_v12 }
0x2959   :  { %1557 = vrot.lane.b32.xlu1 %v1555_v14, %s2069_s11 }
0x29cb   :  { %v1558_v15 = vpop.permute.xlu1 %1557 }
0x29cc   :  { %1954 = vmatmul.mubr.msk.bf16.vlgmr.msra.gmra.mrb[12].mxu1 %vm145_vm4, %v1558_v15 }
0x2a9f   :  { %v1596_v16 = vpop.f32.mrb[12].mxu1 }
0x2aa0   :  { %v1968_v17 = vadd.f32 %v2390_v55, %v1596_v16  ;;  %v1955_v3 = vpop.f32.mrb[13].mxu1  ;;  %v1691_v55 = vld [vmem:[%s2517_s5] ss:$0 sm:$0xff] }
0x2aa1   :  { %v1599_v18 = vpop.f32.mrb[14].mxu1 }
0x2aa2   :  { %v1603_v19 = vmul.f32 %v1968_v17, %v2151_v13  ;;  %v1956_v20 = vpop.f32.mrb[15].mxu1 }
0x2aa4   :  { %2060 = vtanh.f32 %v1603_v19 }
0x2aae   :  { %v2061_v22 = vpop.eup %2060 }
0x2aaf   :  { %v1605_v23 = vmul.f32 %v2061_v22, %v2151_v13  ;;  %v12_v13 = vstv %s2518_s6 }
0x2ab0   :  { %13 = vst [vmem:[#allocation3] sm:$0x1] %v12_v13 }
0x2ab1   :  { %v1606_v24 = vadd.f32 %v1605_v23, %v2154_v21 }
0x2ab3   :  { %1609 = vrot.lane.b32.xlu0 %v1606_v24, %s2068_s1  ;;  %v1607_v27 = vmul.f32 %v1606_v24, %v1547_v9 }
0x2ab7   :  { %v1692_v37 = vld [vmem:[#allocation3] ss:$0 sm:$0xff] }
0x2b25   :  { %v1610_v25 = vpop.permute.xlu0 %1609 }
0x2b26   :  { %v1612_v26 = vmul.f32 %v1610_v25, %v1606_v24 }
0x2b28   :  { %1614 = vrot.lane.b32.xlu1 %v1612_v26, %s2069_s11 }
0x2b2c   :  { %1630 = vrot.lane.b32.xlu1 %v1691_v55, %s2070_s12 }
0x2b9a   :  { %v1615_v28 = vpop.permute.xlu1 %1614 }
0x2b9b   :  { %v1617_v31 = vadd.f32 %v1615_v28, %v1607_v27 }
0x2b9d   :  { %2062 = vtanh.f32 %v1617_v31 }
0x2b9e   :  { %v1631_v32 = vpop.permute.xlu1 %1630 }
0x2ba7   :  { %v2063_v5 = vpop.eup %2062 }
0x2ba8   :  { %1620 = vrot.lane.b32.xlu0 %v2063_v5, %s2068_s1 }
0x2c1a   :  { %v1621_v21 = vpop.permute.xlu0 %1620 }
0x2c1b   :  { %v1623_v33 = vmul.f32 %v1621_v21, %v1606_v24 }
0x2c1d   :  { %v1633_v34 = vmul.f32 %v1631_v32, %v1623_v33 }
0x2c1f   :  { %1635 = vrot.lane.b32.xlu0 %v1633_v34, %s2069_s11 }
0x2c91   :  { %v1636_v35 = vpop.permute.xlu0 %1635 }
0x2c92   :  { %v1638_v36 = vsel %vm145_vm4, %v1636_v35, 0.0 }
0x2c93   :  { %1639 = vadd.xlane.f32.xlu1 %v1638_v36 }
0x2d20   :  { %v1640_v40 = vpop.xlane.xlu1 %1639 }
0x2d21   :  { %v1648_v41 = vadd.f32 %v1692_v37, %v1640_v40 }
0x2d23   :  { %1650 = vst.msk [vmem:[%s2519_s7] sm:$0xff] %vm1649_vm5, %v1648_v41 }

</bundles_post_ra>
